<compile_context>
chip_gen: v5e
topology: v5e:2x2
jax: 0.10.0
libtpu: 0.0.40
codegen_flags: <defaults>
</compile_context>

<pallas_src>
import jax
import jax.numpy as jnp
from jax.experimental import pallas as pl
from jax.experimental.pallas import tpu as pltpu


INPUT_SIZE = 126
HIDDEN_SIZES = [150, 250, 300, 250, 150]
OUTPUT_SIZE = 23

_LANE = 128
_ROW_ALIGN = 16  # bf16 sublane packing for the streamed x / out row tiles


def _round_up(n, m):
    return ((n + m - 1) // m) * m


def _cdiv(a, b):
    return (a + b - 1) // b


def _mlp_kernel(x_ref, *refs):
    """Fused forward pass for one batch tile.

    refs = (w1, b1, w2, b2, ..., w6, b6, o_ref).  Weights/biases are
    VMEM-resident (constant block index); x/out tiles are pipelined over the
    batch grid.  MXU runs in bf16 with f32 accumulation; elementwise work
    (bias add, ReLU) stays in f32.
    """
    o_ref = refs[-1]
    wb = refs[:-1]
    n_layers = len(wb) // 2

    h = x_ref[...]  # already bf16
    for li in range(n_layers):
        w_ref = wb[2 * li]
        b_ref = wb[2 * li + 1]
        acc = jnp.dot(h, w_ref[...], preferred_element_type=jnp.float32) + b_ref[...]
        if li < n_layers - 1:
            # Linear -> ReLU (dropout = identity at inference)
            h = jnp.maximum(acc, 0.0).astype(jnp.bfloat16)
        else:
            # output head: Linear only, bf16 lane-dense store
            o_ref[...] = acc.astype(o_ref.dtype)


def _pad_params(params):
    """Zero-pad each layer to lane-dense (multiple-of-128) widths; W in bf16, b in f32."""
    padded = []
    for w, b in params:
        fan_in, fan_out = w.shape
        in_p = _round_up(fan_in, _LANE)
        out_p = _round_up(fan_out, _LANE)
        w_p = jnp.pad(w.astype(jnp.bfloat16),
                      ((0, in_p - fan_in), (0, out_p - fan_out)))
        b_p = jnp.pad(b.reshape(1, -1).astype(jnp.float32),
                      ((0, 0), (0, out_p - fan_out)))
        padded.append((w_p, b_p))
    return padded


def _choose_tiling(B, bm_target):
    """Pick (bm, b_pad): >=2 (even) grid steps, bm multiple of 16, ~bm_target rows/step."""
    rows = _round_up(max(B, 1), _ROW_ALIGN)
    n_steps = max(2, _cdiv(rows, bm_target))
    if n_steps % 2:
        n_steps += 1
    bm = _round_up(_cdiv(rows, n_steps), _ROW_ALIGN)
    n_steps = _cdiv(rows, bm)
    if n_steps % 2:
        n_steps += 1  # keep even so both v7x TensorCores get equal work
    return bm, bm * n_steps


def dnn_intrusion_forward(x, params, *, bm_target=2048):
    """x: (B, 126) float32.  params: list of (W, b), W (in, out), b (1, out)."""
    B, F = x.shape
    assert F == INPUT_SIZE

    padded_params = _pad_params(params)
    in_pad = _round_up(INPUT_SIZE, _LANE)
    out_pad = _round_up(OUTPUT_SIZE, _LANE)

    bm, b_pad = _choose_tiling(B, bm_target)

    # bf16 input, single padding pass (halves streamed bytes + x double-buffer VMEM).
    x_p = jnp.pad(x.astype(jnp.bfloat16), ((0, b_pad - B), (0, in_pad - F)))

    flat = [x_p]
    in_specs = [pl.BlockSpec((bm, in_pad), lambda i: (i, 0))]
    for w_p, b_p in padded_params:
        flat.append(w_p)
        flat.append(b_p)
        # Full-array blocks, constant block index -> resident across grid steps.
        in_specs.append(pl.BlockSpec(w_p.shape, lambda i: (0, 0)))
        in_specs.append(pl.BlockSpec(b_p.shape, lambda i: (0, 0)))

    # Advisory cost estimate for XLA scheduling around the custom call.
    flops = 2 * b_pad * sum(int(w_p.shape[0]) * int(w_p.shape[1])
                            for w_p, _ in padded_params)
    bytes_accessed = (
        b_pad * (in_pad + out_pad) * 2  # bf16 in/out streaming
        + sum(int(w_p.size) * 2 + int(b_p.size) * 4 for w_p, b_p in padded_params)
    )

    out_padded = pl.pallas_call(
        _mlp_kernel,
        out_shape=jax.ShapeDtypeStruct((b_pad, out_pad), jnp.bfloat16),
        grid=(b_pad // bm,),
        in_specs=in_specs,
        out_specs=pl.BlockSpec((bm, out_pad), lambda i: (i, 0)),
        compiler_params=pltpu.CompilerParams(
            dimension_semantics=("parallel",),
            vmem_limit_bytes=48 << 20,
        ),
        cost_estimate=pl.CostEstimate(
            flops=flops, transcendentals=0, bytes_accessed=bytes_accessed),
    )(*flat)

    return out_padded[:B, :OUTPUT_SIZE].astype(jnp.float32)


def init_params(key):
    """Deterministic init mimicking nn.Linear default: U(-1/sqrt(fan_in), +1/sqrt(fan_in))."""
    sizes = [INPUT_SIZE] + HIDDEN_SIZES + [OUTPUT_SIZE]
    params = []
    for i in range(len(sizes) - 1):
        fan_in, fan_out = sizes[i], sizes[i + 1]
        key, kw, kb = jax.random.split(key, 3)
        bound = 1.0 / jnp.sqrt(jnp.float32(fan_in))
        w = jax.random.uniform(kw, (fan_in, fan_out), jnp.float32, -bound, bound)
        b = jax.random.uniform(kb, (1, fan_out), jnp.float32, -bound, bound)
        params.append((w, b))
    return params


def reference_forward_f32(x, params):
    """Pure-JAX f32 reference (exact module semantics at eval time)."""
    h = x
    for i, (w, b) in enumerate(params):
        h = h @ w + b
        if i < len(params) - 1:
            h = jnp.maximum(h, 0.0)
    return h


def reference_forward_bf16(x, params):
    """Pure-JAX reference mimicking the kernel's bf16-MXU / f32-accumulate numerics."""
    h = x.astype(jnp.bfloat16)
    for i, (w, b) in enumerate(params):
        acc = jnp.dot(h, w.astype(jnp.bfloat16),
                      preferred_element_type=jnp.float32) + b.astype(jnp.float32)
        if i < len(params) - 1:
            h = jnp.maximum(acc, 0.0).astype(jnp.bfloat16)
        else:
            h = acc
    return h


if __name__ == "__main__":
    key = jax.random.PRNGKey(0)
    key, kx = jax.random.split(key)

    B = 8
    x = jax.random.normal(kx, (B, INPUT_SIZE), jnp.float32)
    params = init_params(key)

    out = dnn_intrusion_forward(x, params)
    out = jax.block_until_ready(out)

    ref_bf16 = reference_forward_bf16(x, params)
    ref_f32 = reference_forward_f32(x, params)

    assert out.shape == (B, OUTPUT_SIZE)
    # Tight-ish check vs a reference with matching bf16-input / f32-accumulate numerics
    # (the kernel additionally rounds the final store to bf16).
    assert jnp.allclose(out, ref_bf16, atol=1e-2, rtol=1e-2), "mismatch vs bf16 reference"
    # Loose sanity check vs pure-f32 reference (expected bf16 quantization error).
    assert jnp.allclose(out, ref_f32, atol=1e-1, rtol=1e-1), "mismatch vs f32 reference"

    print("KERNEL_OK")
</pallas_src>

<mosaic_0001>
module attributes {stable_mosaic.version = 11 : i64} {
  func.func @_mlp_kernel(%arg0: i32, %arg1: memref<16x128xbf16, #tpu.memory_space<vmem>>, %arg2: memref<128x256xbf16, #tpu.memory_space<vmem>>, %arg3: memref<1x256xf32, #tpu.memory_space<vmem>>, %arg4: memref<256x256xbf16, #tpu.memory_space<vmem>>, %arg5: memref<1x256xf32, #tpu.memory_space<vmem>>, %arg6: memref<256x384xbf16, #tpu.memory_space<vmem>>, %arg7: memref<1x384xf32, #tpu.memory_space<vmem>>, %arg8: memref<384x256xbf16, #tpu.memory_space<vmem>>, %arg9: memref<1x256xf32, #tpu.memory_space<vmem>>, %arg10: memref<256x256xbf16, #tpu.memory_space<vmem>>, %arg11: memref<1x256xf32, #tpu.memory_space<vmem>>, %arg12: memref<256x128xbf16, #tpu.memory_space<vmem>>, %arg13: memref<1x128xf32, #tpu.memory_space<vmem>>, %arg14: memref<16x128xbf16, #tpu.memory_space<vmem>>) attributes {dimension_semantics = [#tpu.dimension_semantics<parallel>], iteration_bounds = array<i64: 2>, scalar_prefetch = 0 : i64, scratch_operands = 0 : i64, tpu.core_type = #tpu.core_type<tc>, window_params = [{transform_indices = @transform_0, window_bounds = array<i64: 16, 128>}, {pipeline_mode = #tpu.pipeline_mode<synchronous>, transform_indices = @transform_1, window_bounds = array<i64: 128, 256>}, {pipeline_mode = #tpu.pipeline_mode<synchronous>, transform_indices = @transform_2, window_bounds = array<i64: 1, 256>}, {pipeline_mode = #tpu.pipeline_mode<synchronous>, transform_indices = @transform_3, window_bounds = array<i64: 256, 256>}, {pipeline_mode = #tpu.pipeline_mode<synchronous>, transform_indices = @transform_4, window_bounds = array<i64: 1, 256>}, {pipeline_mode = #tpu.pipeline_mode<synchronous>, transform_indices = @transform_5, window_bounds = array<i64: 256, 384>}, {pipeline_mode = #tpu.pipeline_mode<synchronous>, transform_indices = @transform_6, window_bounds = array<i64: 1, 384>}, {pipeline_mode = #tpu.pipeline_mode<synchronous>, transform_indices = @transform_7, window_bounds = array<i64: 384, 256>}, {pipeline_mode = #tpu.pipeline_mode<synchronous>, transform_indices = @transform_8, window_bounds = array<i64: 1, 256>}, {pipeline_mode = #tpu.pipeline_mode<synchronous>, transform_indices = @transform_9, window_bounds = array<i64: 256, 256>}, {pipeline_mode = #tpu.pipeline_mode<synchronous>, transform_indices = @transform_10, window_bounds = array<i64: 1, 256>}, {pipeline_mode = #tpu.pipeline_mode<synchronous>, transform_indices = @transform_11, window_bounds = array<i64: 256, 128>}, {pipeline_mode = #tpu.pipeline_mode<synchronous>, transform_indices = @transform_12, window_bounds = array<i64: 1, 128>}, {transform_indices = @transform_13, window_bounds = array<i64: 16, 128>}]} {
    %c0 = arith.constant 0 : index
    %c0_0 = arith.constant 0 : index
    %0 = vector.load %arg1[%c0, %c0_0] : memref<16x128xbf16, #tpu.memory_space<vmem>>, vector<16x128xbf16>
    %c0_1 = arith.constant 0 : index
    %c0_2 = arith.constant 0 : index
    %1 = vector.load %arg2[%c0_1, %c0_2] : memref<128x256xbf16, #tpu.memory_space<vmem>>, vector<128x256xbf16>
    %cst = arith.constant dense<0.000000e+00> : vector<16x256xf32>
    %2 = tpu.matmul %0, %1, %cst {dimension_numbers = #tpu.dot_dimension_numbers<[1], [0], [0], [1], [0, 0, 1, 1], [], []>} : vector<16x128xbf16>, vector<128x256xbf16>, vector<16x256xf32> -> vector<16x256xf32>
    %c0_3 = arith.constant 0 : index
    %c0_4 = arith.constant 0 : index
    %3 = vector.load %arg3[%c0_3, %c0_4] : memref<1x256xf32, #tpu.memory_space<vmem>>, vector<1x256xf32>
    %4 = vector.broadcast %3 : vector<1x256xf32> to vector<16x256xf32>
    %5 = arith.addf %2, %4 : vector<16x256xf32>
    %cst_5 = arith.constant 0.000000e+00 : f32
    %6 = vector.broadcast %cst_5 : f32 to vector<16x256xf32>
    %7 = arith.maximumf %5, %6 : vector<16x256xf32>
    %8 = arith.truncf %7 : vector<16x256xf32> to vector<16x256xbf16>
    %c0_6 = arith.constant 0 : index
    %c0_7 = arith.constant 0 : index
    %9 = vector.load %arg4[%c0_6, %c0_7] : memref<256x256xbf16, #tpu.memory_space<vmem>>, vector<256x256xbf16>
    %cst_8 = arith.constant dense<0.000000e+00> : vector<16x256xf32>
    %10 = tpu.matmul %8, %9, %cst_8 {dimension_numbers = #tpu.dot_dimension_numbers<[1], [0], [0], [1], [0, 0, 1, 1], [], []>} : vector<16x256xbf16>, vector<256x256xbf16>, vector<16x256xf32> -> vector<16x256xf32>
    %c0_9 = arith.constant 0 : index
    %c0_10 = arith.constant 0 : index
    %11 = vector.load %arg5[%c0_9, %c0_10] : memref<1x256xf32, #tpu.memory_space<vmem>>, vector<1x256xf32>
    %12 = vector.broadcast %11 : vector<1x256xf32> to vector<16x256xf32>
    %13 = arith.addf %10, %12 : vector<16x256xf32>
    %cst_11 = arith.constant 0.000000e+00 : f32
    %14 = vector.broadcast %cst_11 : f32 to vector<16x256xf32>
    %15 = arith.maximumf %13, %14 : vector<16x256xf32>
    %16 = arith.truncf %15 : vector<16x256xf32> to vector<16x256xbf16>
    %c0_12 = arith.constant 0 : index
    %c0_13 = arith.constant 0 : index
    %17 = vector.load %arg6[%c0_12, %c0_13] : memref<256x384xbf16, #tpu.memory_space<vmem>>, vector<256x384xbf16>
    %cst_14 = arith.constant dense<0.000000e+00> : vector<16x384xf32>
    %18 = tpu.matmul %16, %17, %cst_14 {dimension_numbers = #tpu.dot_dimension_numbers<[1], [0], [0], [1], [0, 0, 1, 1], [], []>} : vector<16x256xbf16>, vector<256x384xbf16>, vector<16x384xf32> -> vector<16x384xf32>
    %c0_15 = arith.constant 0 : index
    %c0_16 = arith.constant 0 : index
    %19 = vector.load %arg7[%c0_15, %c0_16] : memref<1x384xf32, #tpu.memory_space<vmem>>, vector<1x384xf32>
    %20 = vector.broadcast %19 : vector<1x384xf32> to vector<16x384xf32>
    %21 = arith.addf %18, %20 : vector<16x384xf32>
    %cst_17 = arith.constant 0.000000e+00 : f32
    %22 = vector.broadcast %cst_17 : f32 to vector<16x384xf32>
    %23 = arith.maximumf %21, %22 : vector<16x384xf32>
    %24 = arith.truncf %23 : vector<16x384xf32> to vector<16x384xbf16>
    %c0_18 = arith.constant 0 : index
    %c0_19 = arith.constant 0 : index
    %25 = vector.load %arg8[%c0_18, %c0_19] : memref<384x256xbf16, #tpu.memory_space<vmem>>, vector<384x256xbf16>
    %cst_20 = arith.constant dense<0.000000e+00> : vector<16x256xf32>
    %26 = tpu.matmul %24, %25, %cst_20 {dimension_numbers = #tpu.dot_dimension_numbers<[1], [0], [0], [1], [0, 0, 1, 1], [], []>} : vector<16x384xbf16>, vector<384x256xbf16>, vector<16x256xf32> -> vector<16x256xf32>
    %c0_21 = arith.constant 0 : index
    %c0_22 = arith.constant 0 : index
    %27 = vector.load %arg9[%c0_21, %c0_22] : memref<1x256xf32, #tpu.memory_space<vmem>>, vector<1x256xf32>
    %28 = vector.broadcast %27 : vector<1x256xf32> to vector<16x256xf32>
    %29 = arith.addf %26, %28 : vector<16x256xf32>
    %cst_23 = arith.constant 0.000000e+00 : f32
    %30 = vector.broadcast %cst_23 : f32 to vector<16x256xf32>
    %31 = arith.maximumf %29, %30 : vector<16x256xf32>
    %32 = arith.truncf %31 : vector<16x256xf32> to vector<16x256xbf16>
    %c0_24 = arith.constant 0 : index
    %c0_25 = arith.constant 0 : index
    %33 = vector.load %arg10[%c0_24, %c0_25] : memref<256x256xbf16, #tpu.memory_space<vmem>>, vector<256x256xbf16>
    %cst_26 = arith.constant dense<0.000000e+00> : vector<16x256xf32>
    %34 = tpu.matmul %32, %33, %cst_26 {dimension_numbers = #tpu.dot_dimension_numbers<[1], [0], [0], [1], [0, 0, 1, 1], [], []>} : vector<16x256xbf16>, vector<256x256xbf16>, vector<16x256xf32> -> vector<16x256xf32>
    %c0_27 = arith.constant 0 : index
    %c0_28 = arith.constant 0 : index
    %35 = vector.load %arg11[%c0_27, %c0_28] : memref<1x256xf32, #tpu.memory_space<vmem>>, vector<1x256xf32>
    %36 = vector.broadcast %35 : vector<1x256xf32> to vector<16x256xf32>
    %37 = arith.addf %34, %36 : vector<16x256xf32>
    %cst_29 = arith.constant 0.000000e+00 : f32
    %38 = vector.broadcast %cst_29 : f32 to vector<16x256xf32>
    %39 = arith.maximumf %37, %38 : vector<16x256xf32>
    %40 = arith.truncf %39 : vector<16x256xf32> to vector<16x256xbf16>
    %c0_30 = arith.constant 0 : index
    %c0_31 = arith.constant 0 : index
    %41 = vector.load %arg12[%c0_30, %c0_31] : memref<256x128xbf16, #tpu.memory_space<vmem>>, vector<256x128xbf16>
    %cst_32 = arith.constant dense<0.000000e+00> : vector<16x128xf32>
    %42 = tpu.matmul %40, %41, %cst_32 {dimension_numbers = #tpu.dot_dimension_numbers<[1], [0], [0], [1], [0, 0, 1, 1], [], []>} : vector<16x256xbf16>, vector<256x128xbf16>, vector<16x128xf32> -> vector<16x128xf32>
    %c0_33 = arith.constant 0 : index
    %c0_34 = arith.constant 0 : index
    %43 = vector.load %arg13[%c0_33, %c0_34] : memref<1x128xf32, #tpu.memory_space<vmem>>, vector<1x128xf32>
    %44 = vector.broadcast %43 : vector<1x128xf32> to vector<16x128xf32>
    %45 = arith.addf %42, %44 : vector<16x128xf32>
    %46 = arith.truncf %45 : vector<16x128xf32> to vector<16x128xbf16>
    %c0_35 = arith.constant 0 : index
    %c0_36 = arith.constant 0 : index
    %47 = vector.load %arg14[%c0_35, %c0_36] : memref<16x128xbf16, #tpu.memory_space<vmem>>, vector<16x128xbf16>
    tpu.vector_store %arg14[%c0_35, %c0_36], %46 {strides = array<i32>} : memref<16x128xbf16, #tpu.memory_space<vmem>>, vector<16x128xbf16>,
    return
  }
  func.func @transform_0(%arg0: i32) -> (i32, i32) {
    %c0_i32 = arith.constant 0 : i32
    %c0_i32_0 = arith.constant 0 : i32
    return %arg0, %c0_i32 : i32, i32
  }
  func.func @transform_1(%arg0: i32) -> (i32, i32) {
    %c0_i32 = arith.constant 0 : i32
    %c0_i32_0 = arith.constant 0 : i32
    %c0_i32_1 = arith.constant 0 : i32
    return %c0_i32, %c0_i32_0 : i32, i32
  }
  func.func @transform_2(%arg0: i32) -> (i32, i32) {
    %c0_i32 = arith.constant 0 : i32
    %c0_i32_0 = arith.constant 0 : i32
    %c0_i32_1 = arith.constant 0 : i32
    return %c0_i32, %c0_i32_0 : i32, i32
  }
  func.func @transform_3(%arg0: i32) -> (i32, i32) {
    %c0_i32 = arith.constant 0 : i32
    %c0_i32_0 = arith.constant 0 : i32
    %c0_i32_1 = arith.constant 0 : i32
    return %c0_i32, %c0_i32_0 : i32, i32
  }
  func.func @transform_4(%arg0: i32) -> (i32, i32) {
    %c0_i32 = arith.constant 0 : i32
    %c0_i32_0 = arith.constant 0 : i32
    %c0_i32_1 = arith.constant 0 : i32
    return %c0_i32, %c0_i32_0 : i32, i32
  }
  func.func @transform_5(%arg0: i32) -> (i32, i32) {
    %c0_i32 = arith.constant 0 : i32
    %c0_i32_0 = arith.constant 0 : i32
    %c0_i32_1 = arith.constant 0 : i32
    return %c0_i32, %c0_i32_0 : i32, i32
  }
  func.func @transform_6(%arg0: i32) -> (i32, i32) {
    %c0_i32 = arith.constant 0 : i32
    %c0_i32_0 = arith.constant 0 : i32
    %c0_i32_1 = arith.constant 0 : i32
    return %c0_i32, %c0_i32_0 : i32, i32
  }
  func.func @transform_7(%arg0: i32) -> (i32, i32) {
    %c0_i32 = arith.constant 0 : i32
    %c0_i32_0 = arith.constant 0 : i32
    %c0_i32_1 = arith.constant 0 : i32
    return %c0_i32, %c0_i32_0 : i32, i32
  }
  func.func @transform_8(%arg0: i32) -> (i32, i32) {
    %c0_i32 = arith.constant 0 : i32
    %c0_i32_0 = arith.constant 0 : i32
    %c0_i32_1 = arith.constant 0 : i32
    return %c0_i32, %c0_i32_0 : i32, i32
  }
  func.func @transform_9(%arg0: i32) -> (i32, i32) {
    %c0_i32 = arith.constant 0 : i32
    %c0_i32_0 = arith.constant 0 : i32
    %c0_i32_1 = arith.constant 0 : i32
    return %c0_i32, %c0_i32_0 : i32, i32
  }
  func.func @transform_10(%arg0: i32) -> (i32, i32) {
    %c0_i32 = arith.constant 0 : i32
    %c0_i32_0 = arith.constant 0 : i32
    %c0_i32_1 = arith.constant 0 : i32
    return %c0_i32, %c0_i32_0 : i32, i32
  }
  func.func @transform_11(%arg0: i32) -> (i32, i32) {
    %c0_i32 = arith.constant 0 : i32
    %c0_i32_0 = arith.constant 0 : i32
    %c0_i32_1 = arith.constant 0 : i32
    return %c0_i32, %c0_i32_0 : i32, i32
  }
  func.func @transform_12(%arg0: i32) -> (i32, i32) {
    %c0_i32 = arith.constant 0 : i32
    %c0_i32_0 = arith.constant 0 : i32
    %c0_i32_1 = arith.constant 0 : i32
    return %c0_i32, %c0_i32_0 : i32, i32
  }
  func.func @transform_13(%arg0: i32) -> (i32, i32) {
    %c0_i32 = arith.constant 0 : i32
    %c0_i32_0 = arith.constant 0 : i32
    return %arg0, %c0_i32 : i32, i32
  }
}

</mosaic_0001>

<bundles_post_ra>
// kernel: tpu_custom_call.1
= control target key start
LH: loop header
LB: loop body
LE: loop exit
PB: predicated region body
PF: predicated region fallthrough
CT: control target
= control target key end

     0   :  { %s4125_s0 = inlined_call_operand.hbm [shape: bf16[32,128], index: 0, kind: input, shape index: {}]   ;;  %s4126_s1 = inlined_call_operand.hbm [shape: bf16[128,256], index: 1, kind: input, shape index: {}]   ;;  %s4127_s2 = inlined_call_operand.hbm [shape: f32[1,256], index: 2, kind: input, shape index: {}]   ;;  %s4128_s3 = inlined_call_operand.hbm [shape: bf16[256,256], index: 3, kind: input, shape index: {}]   ;;  %s4129_s4 = inlined_call_operand.vmem [shape: f32[1,256], index: 4, kind: input, shape index: {}]   ;;  %s4130_s5 = inlined_call_operand.hbm [shape: bf16[256,384], index: 5, kind: input, shape index: {}]   ;;  %s4131_s6 = inlined_call_operand.vmem [shape: f32[1,384], index: 6, kind: input, shape index: {}]   ;;  %s4132_s7 = inlined_call_operand.hbm [shape: bf16[384,256], index: 7, kind: input, shape index: {}]   ;;  %s4133_s8 = inlined_call_operand.vmem [shape: f32[1,256], index: 8, kind: input, shape index: {}]   ;;  %s4134_s9 = inlined_call_operand.hbm [shape: bf16[256,256], index: 9, kind: input, shape index: {}]   ;;  %s4135_s10 = inlined_call_operand.vmem [shape: f32[1,256], index: 10, kind: input, shape index: {}]   ;;  %s4136_s11 = inlined_call_operand.hbm [shape: bf16[256,128], index: 11, kind: input, shape index: {}]   ;;  %s4137_s12 = inlined_call_operand.vmem [shape: f32[1,128], index: 12, kind: input, shape index: {}]   ;;  %s4138_s13 = inlined_call_operand.hbm [shape: bf16[32,128], index: 13, kind: output, shape index: {}]  }
   0x1   :  { %4142 = sst [smem:[#allocation23_spill]] %s4126_s1 }
   0x2   :  { %4143 = sst [smem:[#allocation24_spill]] %s4127_s2 }
   0x3   :  { %4144 = sst [smem:[#allocation25_spill]] %s4128_s3 }
   0x4   :  { %4145 = sst [smem:[#allocation26_spill]] %s4130_s5 }
   0x5   :  { %4146 = sst [smem:[#allocation27_spill]] %s4132_s7 }
   0x6   :  { %4147 = sst [smem:[#allocation28_spill]] %s4134_s9 }
   0x7   :  { %4148 = sst [smem:[#allocation29_spill]] %s4138_s13 }
   0x8   :  { %18 = vsyncpa [#allocation3], 0 }
   0x9   :  { %20 = vsyncpa [#allocation3 + $0x1], 0 }
   0xa   :  { %21 = vsyncpa [#allocation6], 0 }
   0xb   :  { %22 = vsyncpa [#allocation9], 0 }
   0xc   :  { %23 = vsyncpa [#allocation12], 0 }
   0xd   :  { %24 = vsyncpa [#allocation15], 0 }
   0xe   :  { %25 = vsyncpa [#allocation4], 0 }
   0xf   :  { %27 = vsyncpa [#allocation4 + $0x1], 0  ;;  %s3901_s25 = smov 0   ;;  %s3903_s26 = smov 0  }
  0x10   :  { %s3905_s27 = smov 0   ;;  %s3907_s28 = smov 0  }
  0x11 LB: > { %s4149_s1 = sld [smem:[#allocation23_spill]]  ;;  %s3925_s15 = sadd.s32 4294967295, %s3814_s28   ;;  %s3814_s28 = sphi %s3907_s28, %s4168_s28   ;;  %s3810_s27 = sphi %s3905_s27, %s4167_s27   ;;  %s3806_s26 = sphi %s3903_s26, %s4166_s26   ;;  %s3802_s25 = sphi %s3901_s25, %s4165_s25  }
  0x12   : > { %p2367_p0 = scmp.ge.s32.totalorder %s3814_s28, 1  ;;  %p54_p1 = scmp.eq.s32.totalorder %s3925_s15, 0 }
  0x13   : > { %p342_p2 = scmp.lt.s32.totalorder %s3814_s28, 3  ;;  %s3816_s17 = smov [#allocation5]  }
  0x14   : > { %s355_s18 = sshll.u32 %s3816_s17, 4  ;;  %s4151_s3 = sld [smem:[#allocation25_spill]]  ;;  %s356_s18 = int_to_ptr.vmem [resolvable:$true] %s355_s18 }
  0x15   : > { %p3930_p3 = pnand %p2367_p0, %p342_p2  ;;  %s4153_s7 = sld [smem:[#allocation27_spill]] }
  0x16   : > { %s3817_s30 = smov [#allocation8]   ;;  %s3819_s13 = smov 8  }
  0x17   : > { %s353_s14 = sshll.u32 %s4149_s1, 4  ;;  %p3398_p4 = pneg %p3930_p3  ;;  %s354_s14 = int_to_ptr.hbm [resolvable:$true] %s353_s14 }
  0x18   : > { %s381_s17 = sshll.u32 %s3817_s30, 4  ;;  %s3818_s1 = smov 128   ;;  %s382_s17 = int_to_ptr.vmem [resolvable:$true] %s381_s17 }
  0x19   : > { %p3942_p6 = pnand %p3398_p4, %p54_p1  ;;  %s4154_s2 = sld [smem:[#allocation24_spill]] }
  0x1a   : > { %s379_s21 = sshll.u32 %s4151_s3, 4  ;;  %s3820_s24 = smov [#allocation11]   ;;  %s380_s21 = int_to_ptr.hbm [resolvable:$true] %s379_s21 }
  0x1b   : > { %s413_s29 = sshll.u32 %s4153_s7, 4  ;;  %s415_s30 = sshll.u32 %s3820_s24, 4  ;;  %s414_s29 = int_to_ptr.hbm [resolvable:$true] %s413_s29  ;;  %s416_s30 = int_to_ptr.vmem [resolvable:$true] %s415_s30 }
  0x1c   : > { %3401 = dma.hbm_to_vmem [thread:$0]  (!%p3942_p6), %s354_s14, 2048, %s356_s18, [#allocation6], %s3818_s1, %s3818_s1, %s3819_s13  }
  0x1d   : > { %3407 = dma.hbm_to_vmem [thread:$0]  (!%p3942_p6), %s380_s21, 4096, %s382_s17, [#allocation9], %s3818_s1, %s3818_s1, %s3819_s13  }
  0x1e   : > { %3413 = dma.hbm_to_vmem [thread:$0]  (!%p3942_p6), %s414_s29, 6144, %s416_s30, [#allocation12], %s3818_s1, %s3818_s1, %s3819_s13  }
  0x1f   : > { %s368_s23 = sshll.u32 %s4154_s2, 4  ;;  %s3821_s14 = smov [#allocation7]   ;;  %s369_s23 = int_to_ptr.hbm [resolvable:$true] %s368_s23 }
  0x20   : > { %s370_s18 = sshll.u32 %s3821_s14, 4  ;;  %s4155_s5 = sld [smem:[#allocation26_spill]]  ;;  %s371_s18 = int_to_ptr.vmem [resolvable:$true] %s370_s18 }
  0x21   : > { %3404 = dma.hbm_to_vmem [thread:$0]  (!%p3942_p6), %s369_s23, 32, %s371_s18, [#allocation6]  }
  0x22   : > { %s3822_s17 = smov [#allocation10]   ;;  %s4156_s9 = sld [smem:[#allocation28_spill]] }
  0x23   : > { %s398_s19 = sshll.u32 %s3822_s17, 4  ;;  %s3823_s29 = smov 192   ;;  %s399_s19 = int_to_ptr.vmem [resolvable:$true] %s398_s19 }
  0x24   : > { %s3824_s30 = smov 12   ;;  %s3825_s3 = smov [#allocation13]  }
  0x25   : > { %s432_s7 = sshll.u32 %s3825_s3, 4  ;;  %s447_s18 = sshll.u32 %s4136_s11, 4  ;;  %s433_s7 = int_to_ptr.vmem [resolvable:$true] %s432_s7  ;;  %s448_s18 = int_to_ptr.hbm [resolvable:$true] %s447_s18 }
  0x26   : > { %s396_s21 = sshll.u32 %s4155_s5, 4  ;;  %s4141_s20 = smov 4   ;;  %s397_s21 = int_to_ptr.hbm [resolvable:$true] %s396_s21 }
  0x27   : > { %3410 = dma.hbm_to_vmem [thread:$0]  (!%p3942_p6), %s397_s21, 6144, %s399_s19, [#allocation9], %s3823_s29, %s3823_s29, %s3824_s30  }
  0x28   : > { %s430_s2 = sshll.u32 %s4156_s9, 4  ;;  %s3826_s21 = smov [#allocation14]   ;;  %s431_s2 = int_to_ptr.hbm [resolvable:$true] %s430_s2 }
  0x29   : > { %3416 = dma.hbm_to_vmem [thread:$0]  (!%p3942_p6), %s431_s2, 4096, %s433_s7, [#allocation12], %s3818_s1, %s3818_s1, %s3819_s13  }
  0x2a   : > { %s449_s17 = sshll.u32 %s3826_s21, 4  ;;  %s4140_s19 = smov 64   ;;  %s450_s17 = int_to_ptr.vmem [resolvable:$true] %s449_s17 }
  0x2b   : > { %3419 = dma.hbm_to_vmem [thread:$0]  (!%p3942_p6), %s448_s18, 2048, %s450_s17, [#allocation15], %s4140_s19, %s4140_s19, %s4141_s20  }
  0x2c   : > { %s2366_s24 = sadd.s32 4294967294, %s3814_s28   ;;  %s3992_s29 = sadd.s32 1, %s3814_s28  }
  0x2d   : > { %s40_s30 = sadd.s32 1, %s3810_s27  ;;  %s37_s1 = ssub.s32 %s3814_s28, %s3992_s29 }
  0x2e   : > { %p47_p7 = scmp.ne.s32.totalorder %s3810_s27, %s3806_s26  ;;  %p38_p8 = scmp.eq.s32.totalorder %s37_s1, 0 }
  0x2f   : > { %p48_p9 = scmp.eq.s32.totalorder %s3814_s28, 0  ;;  %p53_p10 = scmp.ne.s32.totalorder %s3806_s26, %s3802_s25 }
  0x30   : > { %p329_p11 = scmp.eq.s32.totalorder %s3925_s15, 1  ;;  %p335_p0 = scmp.eq.s32.totalorder %s2366_s24, 1 }
  0x31   : > { %s4004_s2 = scalar_select %p38_p8, %s3810_s27, %s40_s30  }
  0x32   : > { %p4008_p12 = por %p54_p1, %p53_p10  ;;  %p4012_p13 = por %p329_p11, %p47_p7 }
  0x33   : > { %p49_p2 = por %p48_p9, %p47_p7  ;;  %s466_s3 = sand.u32 1, %s3810_s27  }
  0x34   : > { %p4017_p4 = por %p335_p0, %p53_p10  ;;  %p3435_p6 = scmp.lt.s32.totalorder %s3814_s28, 2 }
  0x35   : > { %s2376_s23 = sshll.u32 %s466_s3, 3  ;;  %s3166_s14 = sshll.u32 %s3814_s28, 3 }
  0x36   : > { %s475_s17 = scalar_lea.hbm %s4125_s0, %s3166_s14  ;;  %s470_s1 = scalar_lea.vmem [#allocation2], %s2376_s23 }
  0x37   : > { %s476_s30 = sshll.u32 %s475_s17, 4  ;;  %s478_s19 = sshll.u32 %s470_s1, 4  ;;  %s477_s30 = int_to_ptr.hbm [resolvable:$true] %s476_s30  ;;  %s479_s19 = int_to_ptr.vmem [resolvable:$true] %s478_s19 }
  0x38   : > { %p4026_p8 = pnand %p3435_p6, %p49_p2  ;;  %s467_s20 = scalar_lea.sflag [#allocation3], %s466_s3 }
  0x39   : > { %s3702_s5 = sshra.s32 %s477_s30, 4  ;;  %s3709_s23 = scalar_lea.hbm %s4125_s0, 16  ;;  %s3703_s5 = int_to_ptr.hbm [resolvable:$true] %s3702_s5 }
  0x3a   : > { %s3704_s9 = scalar_lea.hbm %s3703_s5, 8  ;;  %p3706_p9 = pneg %p4026_p8 }
  0x3b   : > { %p3705_p7 = scmp.ne.s32.totalorder %s3703_s5, %s3704_s9  ;;  %p3710_p0 = scmp.lt.s32.totalorder %s3703_s5, %s4125_s0 }
  0x3c   : > { %p3711_p2 = scmp.lt.s32.totalorder %s3709_s23, %s3704_s9 }
  0x3d   : > { %p3707_p10 = pnand %p3706_p9, %p3705_p7 }
  0x3e   : > { %p3712_p6 = por %p3711_p2, %p3710_p0 }
  0x3f   : > { %p3708_p11 = pneg %p3707_p10 }
  0x41   : > { %p3713_p5 = pnand %p3712_p6, %p3708_p11 }
  0x43   : > { %3716 = shalt.err (!%p3713_p5)
}
  0x44   : > { %s4161_s3 = smov 4   ;;  %s4162_s1 = smov 64  }
  0x45   : > { %3423 = dma.hbm_to_vmem [thread:$0]  (!%p4026_p8), %s477_s30, 128, %s479_s19, %s467_s20, %s4162_s1, %s4162_s1, %s4161_s3  }
  0x46   : > { %490 = sbr.rel (%p3930_p3) target bundleno = 1014 (0x3f6), region = 72  ;;  %s4046_s14 = sand.u32 (!%p3930_p3), 1, %s3806_s26  }
  0x47   : > { %s2380_s5 = sshll.u32 (!%p3930_p3), %s4046_s14, 3  ;;  %s493_s9 = scalar_lea.sflag (!%p3930_p3), [#allocation3], %s4046_s14 }
  0x48   : > { %s4052_s18 = scalar_lea.vmem (!%p3930_p3), [#allocation2], %s2380_s5 }
  0x4b   : > { %3777 = dma.done.wait (%p4008_p12), %s493_s9, 128  }
  0x4c   : > { %3779 = vsyncadd (%p4008_p12), %s493_s9, 4294967168 }
  0x4d   : > { %3781 = dma.done.wait (%p54_p1), [#allocation6], 2080  }
  0x4e   : > { %3783 = vsyncadd (%p54_p1), [#allocation6], 4294965216 }
  0x4f   : > { %3785 = dma.done.wait (%p54_p1), [#allocation9], 10240  }
  0x50   : > { %3787 = vsyncadd (%p54_p1), [#allocation9], 4294957056 }
  0x51   : > { %3789 = dma.done.wait (%p54_p1), [#allocation12], 10240  }
  0x52   : > { %3791 = vsyncadd (%p54_p1), [#allocation12], 4294957056 }
  0x53   : > { %3793 = dma.done.wait (%p54_p1), [#allocation15], 2048  }
  0x54   : > { %3795 = vsyncadd (%p54_p1), [#allocation15], 4294965248  ;;  %v2451_v0 = vld [vmem:[#allocation5 + $0x70] sm:$0xf]  ;;  %v3183_v1 = vld [vmem:[#allocation5 + $0x74] sm:$0xf0] }
  0x55   : > { %v3182_v2 = vld [vmem:[#allocation5 + $0x74] sm:$0xf]  ;;  %v2452_v3 = vor.u32 %v3183_v1, %v2451_v0  ;;  %v2453_v4 = vld [vmem:[#allocation5 + $0x78] sm:$0xf0]  ;;  %v2443_v5 = vld [vmem:[#allocation5 + $0x60] sm:$0xf] }
  0x56   : > { %v3181_v6 = vld [vmem:[#allocation5 + $0x64] sm:$0xf0]  ;;  %v2456_v7 = vor.u32 %v3182_v2, %v2453_v4  ;;  %v3180_v8 = vld [vmem:[#allocation5 + $0x64] sm:$0xf]  ;;  %v2445_v9 = vld [vmem:[#allocation5 + $0x68] sm:$0xf0] }
  0x57   : > { %687 = vmatpush.bf16.msra.mxu0 %v2452_v3  ;;  %v2444_v10 = vor.u32 %v3181_v6, %v2443_v5  ;;  %v2448_v11 = vor.u32 %v3180_v8, %v2445_v9  ;;  %v2435_v12 = vld [vmem:[#allocation5 + $0x50] sm:$0xf]  ;;  %v3179_v13 = vld [vmem:[#allocation5 + $0x54] sm:$0xf0]  ;;  %v3178_v14 = vld [vmem:[#allocation5 + $0x54] sm:$0xf] }
  0x58   : > { %701 = vmatpush.bf16.msra.mxu1 %v2456_v7  ;;  %v2437_v15 = vld [vmem:[#allocation5 + $0x58] sm:$0xf0]  ;;  %v2436_v16 = vor.u32 %v3179_v13, %v2435_v12  ;;  %v2427_v18 = vld [vmem:[#allocation5 + $0x40] sm:$0xf]  ;;  %v3177_v19 = vld [vmem:[#allocation5 + $0x44] sm:$0xf0] }
  0x59   : > { %v2440_v17 = vor.u32 %v3178_v14, %v2437_v15  ;;  %v3176_v20 = vld [vmem:[#allocation5 + $0x44] sm:$0xf]  ;;  %v2429_v21 = vld [vmem:[#allocation5 + $0x48] sm:$0xf0]  ;;  %v2428_v22 = vor.u32 %v3177_v19, %v2427_v18  ;;  %v2515_v23 = vld [vmem:[#allocation8 + $0x70] sm:$0xf] }
  0x5a   : > { %v3199_v24 = vld [vmem:[#allocation8 + $0x74] sm:$0xf0]  ;;  %v2579_v25 = vld [vmem:[#allocation8 + $0xf0] sm:$0xf]  ;;  %v2432_v26 = vor.u32 %v3176_v20, %v2429_v21  ;;  %v2507_v34 = vld [vmem:[#allocation8 + $0x60] sm:$0xf] }
  0x5b   : > { %688 = vmatpush.bf16.msra.mxu0 %v2444_v10  ;;  %v2419_v27 = vld [vmem:[#allocation5 + $0x30] sm:$0xf]  ;;  %v3175_v28 = vld [vmem:[#allocation5 + $0x34] sm:$0xf0]  ;;  %v2516_v29 = vor.u32 %v3199_v24, %v2515_v23  ;;  %v3174_v31 = vld [vmem:[#allocation5 + $0x34] sm:$0xf] }
  0x5c   : > { %702 = vmatpush.bf16.msra.mxu1 %v2448_v11  ;;  %v3215_v30 = vld [vmem:[#allocation8 + $0xf4] sm:$0xf0]  ;;  %v3197_v35 = vld [vmem:[#allocation8 + $0x64] sm:$0xf0]  ;;  %v2571_v36 = vld [vmem:[#allocation8 + $0xe0] sm:$0xf]  ;;  %v2420_v38 = vor.u32 %v3175_v28, %v2419_v27 }
  0x5d   : > { %v2421_v32 = vld [vmem:[#allocation5 + $0x38] sm:$0xf0]  ;;  %v2580_v33 = vor.u32 %v3215_v30, %v2579_v25  ;;  %919 = vmatpush.bf16.msra.mxu2 %v2516_v29  ;;  %v3213_v37 = vld [vmem:[#allocation8 + $0xe4] sm:$0xf0]  ;;  %v2411_v39 = vld [vmem:[#allocation5 + $0x20] sm:$0xf]  ;;  %v2508_v41 = vor.u32 %v3197_v35, %v2507_v34 }
  0x5e   : > { %v3173_v40 = vld [vmem:[#allocation5 + $0x24] sm:$0xf0]  ;;  %v2572_v42 = vor.u32 %v3213_v37, %v2571_v36  ;;  %v2424_v43 = vor.u32 %v3174_v31, %v2421_v32  ;;  %v3172_v44 = vld [vmem:[#allocation5 + $0x24] sm:$0xf]  ;;  %v2499_v45 = vld [vmem:[#allocation8 + $0x50] sm:$0xf] }
  0x5f   : > { %689 = vmatpush.bf16.msra.mxu0 %v2436_v16  ;;  %933 = vmatpush.bf16.msra.mxu3 %v2580_v33  ;;  %v3195_v46 = vld [vmem:[#allocation8 + $0x54] sm:$0xf0]  ;;  %v2413_v47 = vld [vmem:[#allocation5 + $0x28] sm:$0xf0]  ;;  %v2563_v48 = vld [vmem:[#allocation8 + $0xd0] sm:$0xf]  ;;  %v2412_v51 = vor.u32 %v3173_v40, %v2411_v39 }
  0x60   : > { %703 = vmatpush.bf16.msra.mxu1 %v2440_v17  ;;  %v3211_v49 = vld [vmem:[#allocation8 + $0xd4] sm:$0xf0]  ;;  %v2500_v50 = vor.u32 %v3195_v46, %v2499_v45  ;;  %v2403_v52 = vld [vmem:[#allocation5 + $0x10] sm:$0xf]  ;;  %v2491_v54 = vld [vmem:[#allocation8 + $0x40] sm:$0xf]  ;;  %v2416_v56 = vor.u32 %v3172_v44, %v2413_v47 }
  0x61   : > { %920 = vmatpush.bf16.msra.mxu2 %v2508_v41  ;;  %v2564_v53 = vor.u32 %v3211_v49, %v2563_v48  ;;  %v3193_v55 = vld [vmem:[#allocation8 + $0x44] sm:$0xf0]  ;;  %v3171_v57 = vld [vmem:[#allocation5 + $0x14] sm:$0xf0]  ;;  %v2555_v58 = vld [vmem:[#allocation8 + $0xc0] sm:$0xf] }
  0x62   : > { %v3209_v59 = vld [vmem:[#allocation8 + $0xc4] sm:$0xf0]  ;;  %v3170_v60 = vld [vmem:[#allocation5 + $0x14] sm:$0xf]  ;;  %v2405_v61 = vld [vmem:[#allocation5 + $0x18] sm:$0xf0]  ;;  %v2492_v62 = vor.u32 %v3193_v55, %v2491_v54  ;;  %v2404_v63 = vor.u32 %v3171_v57, %v2403_v52 }
  0x63   : > { %690 = vmatpush.bf16.msra.mxu0 %v2428_v22  ;;  %934 = vmatpush.bf16.msra.mxu3 %v2572_v42  ;;  %v2556_v0 = vor.u32 %v3209_v59, %v2555_v58  ;;  %v2408_v1 = vor.u32 %v3170_v60, %v2405_v61  ;;  %v2395_v2 = vld [vmem:[#allocation5] sm:$0xf]  ;;  %v3169_v3 = vld [vmem:[#allocation5 + $0x4] sm:$0xf0]  ;;  %v3168_v4 = vld [vmem:[#allocation5 + $0x4] sm:$0xf] }
  0x64   : > { %704 = vmatpush.bf16.msra.mxu1 %v2432_v26  ;;  %v2397_v5 = vld [vmem:[#allocation5 + $0x8] sm:$0xf0]  ;;  %v3198_v6 = vld [vmem:[#allocation8 + $0x74] sm:$0xf]  ;;  %v2517_v7 = vld [vmem:[#allocation8 + $0x78] sm:$0xf0]  ;;  %v2396_v10 = vor.u32 %v3169_v3, %v2395_v2 }
  0x65   : > { %921 = vmatpush.bf16.msra.mxu2 %v2500_v50  ;;  %v3214_v8 = vld [vmem:[#allocation8 + $0xf4] sm:$0xf]  ;;  %v2581_v9 = vld [vmem:[#allocation8 + $0xf8] sm:$0xf0]  ;;  %v2400_v11 = vor.u32 %v3168_v4, %v2397_v5  ;;  %v2520_v12 = vor.u32 %v3198_v6, %v2517_v7  ;;  %v3196_v14 = vld [vmem:[#allocation8 + $0x64] sm:$0xf] }
  0x66   : > { %v2584_v13 = vor.u32 %v3214_v8, %v2581_v9  ;;  %v2509_v15 = vld [vmem:[#allocation8 + $0x68] sm:$0xf0]  ;;  %v3212_v17 = vld [vmem:[#allocation8 + $0xe4] sm:$0xf]  ;;  %v3194_v21 = vld [vmem:[#allocation8 + $0x54] sm:$0xf] }
  0x67   : > { %691 = vmatpush.bf16.msra.mxu0 %v2420_v38  ;;  %935 = vmatpush.bf16.msra.mxu3 %v2564_v53  ;;  %v3167_v16 = vld [vmem:[%s4052_s18] sm:$0xff]  ;;  %v2512_v19 = vor.u32 %v3196_v14, %v2509_v15  ;;  %v3192_v27 = vld [vmem:[#allocation8 + $0x44] sm:$0xf]  ;;  %v2475_v45 = vld [vmem:[#allocation8 + $0x20] sm:$0xf]  ;;  %s3360_s1 = sshll.u32 %s3925_s15, 3 }
  0x68   : > { %705 = vmatpush.bf16.msra.mxu1 %v2424_v43  ;;  %v2573_v18 = vld [vmem:[#allocation8 + $0xe8] sm:$0xf0]  ;;  %v2501_v22 = vld [vmem:[#allocation8 + $0x58] sm:$0xf0]  ;;  %v3210_v23 = vld [vmem:[#allocation8 + $0xd4] sm:$0xf] }
  0x69   : > { %922 = vmatpush.bf16.msra.mxu2 %v2492_v62  ;;  %v2576_v20 = vor.u32 %v3212_v17, %v2573_v18  ;;  %v2565_v24 = vld [vmem:[#allocation8 + $0xd8] sm:$0xf0]  ;;  %v2504_v25 = vor.u32 %v3194_v21, %v2501_v22  ;;  %v2493_v28 = vld [vmem:[#allocation8 + $0x48] sm:$0xf0]  ;;  %v3208_v29 = vld [vmem:[#allocation8 + $0xc4] sm:$0xf] }
  0x6a   : > { %v2568_v26 = vor.u32 %v3210_v23, %v2565_v24  ;;  %v2557_v30 = vld [vmem:[#allocation8 + $0xc8] sm:$0xf0]  ;;  %v2496_v31 = vor.u32 %v3192_v27, %v2493_v28  ;;  %v2483_v33 = vld [vmem:[#allocation8 + $0x30] sm:$0xf]  ;;  %v3191_v34 = vld [vmem:[#allocation8 + $0x34] sm:$0xf0] }
  0x6b   : > { %692 = vmatpush.bf16.msra.mxu0 %v2412_v51  ;;  %936 = vmatpush.bf16.msra.mxu3 %v2556_v0  ;;  %v2560_v32 = vor.u32 %v3208_v29, %v2557_v30  ;;  %v2547_v35 = vld [vmem:[#allocation8 + $0xb0] sm:$0xf]  ;;  %v2484_v36 = vor.u32 %v3191_v34, %v2483_v33  ;;  %v3207_v37 = vld [vmem:[#allocation8 + $0xb4] sm:$0xf0]  ;;  %v3190_v38 = vld [vmem:[#allocation8 + $0x34] sm:$0xf] }
  0x6c   : > { %706 = vmatpush.bf16.msra.mxu1 %v2416_v56  ;;  %v2485_v39 = vld [vmem:[#allocation8 + $0x38] sm:$0xf0]  ;;  %v2548_v40 = vor.u32 %v3207_v37, %v2547_v35  ;;  %v3206_v42 = vld [vmem:[#allocation8 + $0xb4] sm:$0xf]  ;;  %v3189_v46 = vld [vmem:[#allocation8 + $0x24] sm:$0xf0] }
  0x6d   : > { %v2488_v41 = vor.u32 %v3190_v38, %v2485_v39  ;;  %v2549_v43 = vld [vmem:[#allocation8 + $0xb8] sm:$0xf0]  ;;  %923 = vmatpush.bf16.msra.mxu2 %v2484_v36  ;;  %v2476_v47 = vor.u32 %v3189_v46, %v2475_v45  ;;  %v2539_v48 = vld [vmem:[#allocation8 + $0xa0] sm:$0xf]  ;;  %v3205_v49 = vld [vmem:[#allocation8 + $0xa4] sm:$0xf0] }
  0x6e   : > { %v2552_v44 = vor.u32 %v3206_v42, %v2549_v43  ;;  %v3188_v50 = vld [vmem:[#allocation8 + $0x24] sm:$0xf]  ;;  %v2540_v51 = vor.u32 %v3205_v49, %v2539_v48  ;;  %v2477_v52 = vld [vmem:[#allocation8 + $0x28] sm:$0xf0]  ;;  %v2467_v57 = vld [vmem:[#allocation8 + $0x10] sm:$0xf] }
  0x6f   : > { %693 = vmatpush.bf16.msra.mxu0 %v2404_v63  ;;  %937 = vmatpush.bf16.msra.mxu3 %v2548_v40  ;;  %v3204_v53 = vld [vmem:[#allocation8 + $0xa4] sm:$0xf]  ;;  %v2541_v54 = vld [vmem:[#allocation8 + $0xa8] sm:$0xf0]  ;;  %v2480_v55 = vor.u32 %v3188_v50, %v2477_v52  ;;  %v3187_v58 = vld [vmem:[#allocation8 + $0x14] sm:$0xf0] }
  0x70   : > { %707 = vmatpush.bf16.msra.mxu1 %v2408_v1  ;;  %v2544_v56 = vor.u32 %v3204_v53, %v2541_v54  ;;  %v2531_v59 = vld [vmem:[#allocation8 + $0x90] sm:$0xf]  ;;  %v2468_v60 = vor.u32 %v3187_v58, %v2467_v57  ;;  %v3203_v61 = vld [vmem:[#allocation8 + $0x94] sm:$0xf0]  ;;  %v3186_v62 = vld [vmem:[#allocation8 + $0x14] sm:$0xf] }
  0x71   : > { %924 = vmatpush.bf16.msra.mxu2 %v2476_v47  ;;  %v2469_v63 = vld [vmem:[#allocation8 + $0x18] sm:$0xf0]  ;;  %v2532_v0 = vor.u32 %v3203_v61, %v2531_v59  ;;  %v3202_v2 = vld [vmem:[#allocation8 + $0x94] sm:$0xf]  ;;  %v2459_v5 = vld [vmem:[#allocation8] sm:$0xf] }
  0x72   : > { %v2472_v1 = vor.u32 %v3186_v62, %v2469_v63  ;;  %v2533_v3 = vld [vmem:[#allocation8 + $0x98] sm:$0xf0]  ;;  %v3185_v6 = vld [vmem:[#allocation8 + $0x4] sm:$0xf0]  ;;  %v2523_v7 = vld [vmem:[#allocation8 + $0x80] sm:$0xf] }
  0x73   : > { %694 = vmatpush.bf16.msra.mxu0 %v2396_v10  ;;  %938 = vmatpush.bf16.msra.mxu3 %v2540_v51  ;;  %v2536_v4 = vor.u32 %v3202_v2, %v2533_v3  ;;  %v2460_v8 = vor.u32 %v3185_v6, %v2459_v5  ;;  %v3201_v9 = vld [vmem:[#allocation8 + $0x84] sm:$0xf0]  ;;  %v3184_v10 = vld [vmem:[#allocation8 + $0x4] sm:$0xf]  ;;  %v2525_v15 = vld [vmem:[#allocation8 + $0x88] sm:$0xf0] }
  0x74   : > { %708 = vmatpush.bf16.msra.mxu1 %v2400_v11  ;;  %v2461_v11 = vld [vmem:[#allocation8 + $0x8] sm:$0xf0]  ;;  %v3200_v14 = vld [vmem:[#allocation8 + $0x84] sm:$0xf]  ;;  %v2767_v17 = vld [vmem:[#allocation10 + $0x168] sm:$0xf] }
  0x75   : > { %925 = vmatpush.bf16.msra.mxu2 %v2468_v60  ;;  %v3262_v18 = vld [vmem:[#allocation10 + $0x170] sm:$0xf0]  ;;  %v3259_v21 = vld [vmem:[#allocation10 + $0x158] sm:$0xf0]  ;;  %v2671_v22 = vld [vmem:[#allocation10 + $0xa8] sm:$0xf] }
  0x76   : > { %695 = vmatmul.bf16.vlgmr.msra.gmra.mxu0 %v3167_v16  ;;  %v3238_v23 = vld [vmem:[#allocation10 + $0xb0] sm:$0xf0]  ;;  %v2743_v27 = vld [vmem:[#allocation10 + $0x138] sm:$0xf]  ;;  %v3235_v28 = vld [vmem:[#allocation10 + $0x98] sm:$0xf0] }
  0x77   : > { %947 = vmatpush.bf16.msrb.mxu0 %v2520_v12  ;;  %709 = vmatmul.bf16.vlgmr.msra.gmra.mxu1 %v3167_v16  ;;  %v2524_v12 = vor.u32 %v3201_v9, %v2523_v7  ;;  %v2528_v16 = vor.u32 %v3200_v14, %v2525_v15  ;;  %v2672_v24 = vor.u32 %v3238_v23, %v2671_v22  ;;  %v3256_v29 = vld [vmem:[#allocation10 + $0x140] sm:$0xf0]  ;;  %v2647_v34 = vld [vmem:[#allocation10 + $0x78] sm:$0xf]  ;;  %v3258_v36 = vld [vmem:[#allocation10 + $0x154] sm:$0xf] }
  0x78   : > { %961 = vmatpush.bf16.msrb.mxu1 %v2584_v13  ;;  %939 = vmatpush.bf16.msra.mxu3 %v2532_v0  ;;  %v2464_v13 = vor.u32 %v3184_v10, %v2461_v11  ;;  %v3232_v35 = vld [vmem:[#allocation10 + $0x80] sm:$0xf0]  ;;  %v2757_v37 = vld [vmem:[#allocation10 + $0x15c] sm:$0xf0]  ;;  %v2744_v38 = vor.u32 %v3256_v29, %v2743_v27  ;;  %v3237_v40 = vld [vmem:[#allocation10 + $0xac] sm:$0xf] }
  0x79   : > { %926 = vmatpush.bf16.msra.mxu2 %v2460_v8  ;;  %v2760_v39 = vor.u32 %v3258_v36, %v2757_v37  ;;  %v2731_v42 = vld [vmem:[#allocation10 + $0x120] sm:$0xf]  ;;  %v3253_v43 = vld [vmem:[#allocation10 + $0x128] sm:$0xf0]  ;;  %v3255_v46 = vld [vmem:[#allocation10 + $0x13c] sm:$0xf] }
  0x7a   : > { %v2635_v47 = vld [vmem:[#allocation10 + $0x60] sm:$0xf]  ;;  %v3229_v48 = vld [vmem:[#allocation10 + $0x68] sm:$0xf0]  ;;  %v2745_v49 = vld [vmem:[#allocation10 + $0x144] sm:$0xf0]  ;;  %v2732_v52 = vor.u32 %v3253_v43, %v2731_v42 }
  0x7b   : > { %948 = vmatpush.bf16.msrb.mxu0 %v2512_v19  ;;  %v2755_v19 = vld [vmem:[#allocation10 + $0x150] sm:$0xf]  ;;  %v3234_v50 = vld [vmem:[#allocation10 + $0x94] sm:$0xf]  ;;  %v2661_v51 = vld [vmem:[#allocation10 + $0x9c] sm:$0xf0]  ;;  %v2748_v54 = vor.u32 %v3255_v46, %v2745_v49  ;;  %v2636_v57 = vor.u32 %v3229_v48, %v2635_v47 }
  0x7c   : > { %962 = vmatpush.bf16.msrb.mxu1 %v2576_v20  ;;  %940 = vmatpush.bf16.msra.mxu3 %v2524_v12  ;;  %v2768_v20 = vor.u32 %v3262_v18, %v2767_v17  ;;  %v2719_v53 = vld [vmem:[#allocation10 + $0x108] sm:$0xf]  ;;  %v3252_v58 = vld [vmem:[#allocation10 + $0x124] sm:$0xf]  ;;  %v2733_v59 = vld [vmem:[#allocation10 + $0x12c] sm:$0xf0] }
  0x7d   : > { %1309 = vmatpush.bf16.msrb.mxu2 %v2672_v24  ;;  %v2623_v60 = vld [vmem:[#allocation10 + $0x48] sm:$0xf]  ;;  %v3226_v61 = vld [vmem:[#allocation10 + $0x50] sm:$0xf0]  ;;  %v2736_v63 = vor.u32 %v3252_v58, %v2733_v59  ;;  %v595_v0 = vld [vmem:[#allocation7] sm:$0x3] }
  0x7e   : > { %v2707_v2 = vld [vmem:[#allocation10 + $0xf0] sm:$0xf]  ;;  %v3247_v3 = vld [vmem:[#allocation10 + $0xf8] sm:$0xf0]  ;;  %v597_v8 = vperm.slane %v595_v0, 0  ;;  %v598_v10 = vperm.slane %v595_v0, 1 }
  0x7f   : > { %949 = vmatpush.bf16.msrb.mxu0 %v2504_v25  ;;  %v2659_v25 = vld [vmem:[#allocation10 + $0x90] sm:$0xf]  ;;  %v3223_v7 = vld [vmem:[#allocation10 + $0x38] sm:$0xf0]  ;;  %v2708_v9 = vor.u32 %v3247_v3, %v2707_v2  ;;  %v2695_v11 = vld [vmem:[#allocation10 + $0xd8] sm:$0xf] }
  0x80   : > { %963 = vmatpush.bf16.msrb.mxu1 %v2568_v26  ;;  %1323 = vmatpush.bf16.msrb.mxu3 %v2768_v20  ;;  %v2756_v26 = vor.u32 %v3259_v21, %v2755_v19  ;;  %v2660_v30 = vor.u32 %v3235_v28, %v2659_v25  ;;  %v2611_v6 = vld [vmem:[#allocation10 + $0x30] sm:$0xf]  ;;  %v3244_v12 = vld [vmem:[#allocation10 + $0xe0] sm:$0xf0]  ;;  %v3231_v27 = vld [vmem:[#allocation10 + $0x7c] sm:$0xf] }
  0x81   : > { %v2696_v15 = vor.u32 %v3244_v12, %v2695_v11  ;;  %v2649_v28 = vld [vmem:[#allocation10 + $0x84] sm:$0xf0]  ;;  %v3263_v37 = vld [vmem:[#allocation10 + $0x178] sm:$0xf0]  ;;  %v3228_v42 = vld [vmem:[#allocation10 + $0x64] sm:$0xf] }
  0x82   : > { %1310 = vmatpush.bf16.msrb.mxu2 %v2660_v30  ;;  %v2652_v29 = vor.u32 %v3231_v27, %v2649_v28  ;;  %v2683_v30 = vld [vmem:[#allocation10 + $0xc0] sm:$0xf]  ;;  %v2637_v43 = vld [vmem:[#allocation10 + $0x6c] sm:$0xf0]  ;;  %v2763_v47 = vld [vmem:[#allocation10 + $0x158] sm:$0xf] }
  0x83   : > { %950 = vmatpush.bf16.msrb.mxu0 %v2496_v31  ;;  %v3261_v31 = vld [vmem:[#allocation10 + $0x16c] sm:$0xf]  ;;  %v2709_v46 = vld [vmem:[#allocation10 + $0xfc] sm:$0xf0]  ;;  %v3260_v49 = vld [vmem:[#allocation10 + $0x160] sm:$0xf0] }
  0x84   : > { %964 = vmatpush.bf16.msrb.mxu1 %v2560_v32  ;;  %v2769_v32 = vld [vmem:[#allocation10 + $0x174] sm:$0xf0]  ;;  %1324 = vmatpush.bf16.msrb.mxu3 %v2756_v26  ;;  %v3239_v58 = vld [vmem:[#allocation10 + $0xb8] sm:$0xf0]  ;;  %v3257_v0 = vld [vmem:[#allocation10 + $0x148] sm:$0xf0] }
  0x85   : > { %v2772_v33 = vor.u32 %v3261_v31, %v2769_v32  ;;  %v3241_v31 = vld [vmem:[#allocation10 + $0xc8] sm:$0xf0]  ;;  %v3222_v2 = vld [vmem:[#allocation10 + $0x34] sm:$0xf]  ;;  %v2613_v3 = vld [vmem:[#allocation10 + $0x3c] sm:$0xf0] }
  0x86   : > { %v2684_v32 = vor.u32 %v3241_v31, %v2683_v30  ;;  %v3254_v12 = vld [vmem:[#allocation10 + $0x130] sm:$0xf0]  ;;  %v3248_v30 = vld [vmem:[#allocation10 + $0x100] sm:$0xf0]  ;;  %s4163_s16 = sld [smem:[#allocation29_spill]]  ;;  %s574_s20 = scalar_lea.vmem [#allocation16], %s2380_s5 }
  0x87   : > { %951 = vmatpush.bf16.msrb.mxu0 %v2488_v41  ;;  %v2673_v41 = vld [vmem:[#allocation10 + $0xb4] sm:$0xf0]  ;;  %v3230_v27 = vld [vmem:[#allocation10 + $0x70] sm:$0xf0]  ;;  %s2223_s13 = sshll.u32 %s574_s20, 4  ;;  %s2211_s15 = scalar_lea.sflag [#allocation4], %s4046_s14  ;;  %s2224_s13 = int_to_ptr.vmem [resolvable:$true] %s2223_s13 }
  0x88   : > { %965 = vmatpush.bf16.msrb.mxu1 %v2552_v44  ;;  %v2648_v44 = vor.u32 %v3232_v35, %v2647_v34  ;;  %v2676_v45 = vor.u32 %v3237_v40, %v2673_v41  ;;  %1325 = vmatpush.bf16.msrb.mxu3 %v2744_v38  ;;  %v2721_v34 = vld [vmem:[#allocation10 + $0x114] sm:$0xf0]  ;;  %v2775_v35 = vld [vmem:[#allocation10 + $0x170] sm:$0xf] }
  0x89   : > { %v2599_v38 = vld [vmem:[#allocation10 + $0x18] sm:$0xf]  ;;  %v2776_v40 = vor.u32 %v3263_v37, %v2775_v35  ;;  %v2703_v35 = vld [vmem:[#allocation10 + $0xe0] sm:$0xf] }
  0x8a   : > { %1311 = vmatpush.bf16.msrb.mxu2 %v2648_v44  ;;  %v2640_v44 = vor.u32 %v3228_v42, %v2637_v43  ;;  %v2619_v37 = vld [vmem:[#allocation10 + $0x38] sm:$0xf]  ;;  %v2607_v43 = vld [vmem:[#allocation10 + $0x20] sm:$0xf] }
  0x8b   : > { %952 = vmatpush.bf16.msrb.mxu0 %v2480_v55  ;;  %v2664_v55 = vor.u32 %v3234_v50, %v2661_v51  ;;  %v2587_v50 = vld [vmem:[#allocation10] sm:$0xf]  ;;  %v2764_v51 = vor.u32 %v3260_v49, %v2763_v47 }
  0x8c   : > { %966 = vmatpush.bf16.msrb.mxu1 %v2544_v56  ;;  %v3250_v56 = vld [vmem:[#allocation10 + $0x110] sm:$0xf0]  ;;  %1326 = vmatpush.bf16.msrb.mxu3 %v2732_v52  ;;  %v3217_v52 = vld [vmem:[#allocation10 + $0x8] sm:$0xf0]  ;;  %s2222_s19 = scalar_lea.hbm %s4163_s16, %s3360_s1  ;;  %s3752_s5 = scalar_lea.hbm %s4163_s16, 16 }
  0x8d   : > { %v2720_v62 = vor.u32 %v3250_v56, %v2719_v53  ;;  %v3225_v53 = vld [vmem:[#allocation10 + $0x4c] sm:$0xf]  ;;  %s2225_s30 = sshll.u32 %s2222_s19, 4  ;;  %s2226_s30 = int_to_ptr.hbm [resolvable:$true] %s2225_s30 }
  0x8e   : > { %1312 = vmatpush.bf16.msrb.mxu2 %v2636_v57  ;;  %v2679_v57 = vld [vmem:[#allocation10 + $0xb0] sm:$0xf]  ;;  %s3746_s24 = sshra.s32 %s2226_s30, 4  ;;  %s3747_s24 = int_to_ptr.hbm [resolvable:$true] %s3746_s24 }
  0x8f   : > { %953 = vmatpush.bf16.msrb.mxu0 %v2472_v1  ;;  %v2680_v59 = vor.u32 %v3239_v58, %v2679_v57  ;;  %v2835_v58 = vld [vmem:[#allocation11 + $0x70] sm:$0xf]  ;;  %s3748_s23 = scalar_lea.hbm %s3747_s24, 8  ;;  %p3753_p12 = scmp.lt.s32.totalorder %s3747_s24, %s4163_s16 }
  0x90   : > { %967 = vmatpush.bf16.msrb.mxu1 %v2536_v4  ;;  %v2624_v4 = vor.u32 %v3226_v61, %v2623_v60  ;;  %1327 = vmatpush.bf16.msrb.mxu3 %v2720_v62  ;;  %v3243_v60 = vld [vmem:[#allocation10 + $0xdc] sm:$0xf]  ;;  %v2697_v61 = vld [vmem:[#allocation10 + $0xe4] sm:$0xf0]  ;;  %v2751_v62 = vld [vmem:[#allocation10 + $0x140] sm:$0xf]  ;;  %p3749_p1 = scmp.ne.s32.totalorder %s3747_s24, %s3748_s23  ;;  %p3754_p8 = scmp.lt.s32.totalorder %s3752_s5, %s3748_s23 }
  0x92   : > { %1313 = vmatpush.bf16.msrb.mxu2 %v2624_v4  ;;  %v2667_v4 = vld [vmem:[#allocation10 + $0x98] sm:$0xf]  ;;  %p3750_p3 = pnand %p3749_p1, %p4012_p13  ;;  %p3755_p7 = por %p3754_p8, %p3753_p12 }
  0x93   : > { %954 = vmatpush.bf16.msrb.mxu0 %v2464_v13  ;;  %v2612_v13 = vor.u32 %v3223_v7, %v2611_v6  ;;  %v3236_v6 = vld [vmem:[#allocation10 + $0xa0] sm:$0xf0] }
  0x94   : > { %968 = vmatpush.bf16.msrb.mxu1 %v2528_v16  ;;  %1328 = vmatpush.bf16.msrb.mxu3 %v2708_v9  ;;  %v2668_v7 = vor.u32 %v3236_v6, %v2667_v4  ;;  %v2685_v9 = vld [vmem:[#allocation10 + $0xcc] sm:$0xf0]  ;;  %v3293_v6 = vld [vmem:[#allocation11 + $0xe4] sm:$0xf0]  ;;  %p3751_p5 = pneg %p3750_p3 }
  0x96   : > { %1314 = vmatpush.bf16.msrb.mxu2 %v2612_v13  ;;  %p3756_p9 = pnand %p3755_p7, %p3751_p5 }
  0x97   : > { %1337 = vmatpush.bf16.msra.mxu0 %v2676_v45  ;;  %v3246_v45 = vld [vmem:[#allocation10 + $0xf4] sm:$0xf] }
  0x98   : > { %1351 = vmatpush.bf16.msra.mxu1 %v2772_v33  ;;  %1329 = vmatpush.bf16.msrb.mxu3 %v2696_v15  ;;  %v3249_v33 = vld [vmem:[#allocation10 + $0x10c] sm:$0xf]  ;;  %v2712_v48 = vor.u32 %v3246_v45, %v2709_v46  ;;  %v2601_v15 = vld [vmem:[#allocation10 + $0x24] sm:$0xf0] }
  0x99   : > { %v2724_v36 = vor.u32 %v3249_v33, %v2721_v34  ;;  %v3227_v33 = vld [vmem:[#allocation10 + $0x58] sm:$0xf0]  ;;  %v753_v46 = vld [vmem:[%s4129_s4] sm:$0x3] }
  0x9a   : > { %v756_v49 = vperm.slane %v753_v46, 1 }
  0x9b   : > { %1338 = vmatpush.bf16.msra.mxu0 %v2664_v55  ;;  %v2588_v55 = vor.u32 %v3217_v52, %v2587_v50  ;;  %v3218_v52 = vld [vmem:[#allocation10 + $0x10] sm:$0xf0] }
  0x9c   : > { %1352 = vmatpush.bf16.msra.mxu1 %v2760_v39  ;;  %v3220_v39 = vld [vmem:[#allocation10 + $0x20] sm:$0xf0]  ;;  %1330 = vmatpush.bf16.msrb.mxu3 %v2684_v32  ;;  %v2631_v32 = vld [vmem:[#allocation10 + $0x50] sm:$0xf] }
  0x9d   : > { %v2600_v41 = vor.u32 %v3220_v39, %v2599_v38  ;;  %v2632_v34 = vor.u32 %v3227_v33, %v2631_v32  ;;  %v3224_v39 = vld [vmem:[#allocation10 + $0x40] sm:$0xf0]  ;;  %v3289_v32 = vld [vmem:[#allocation11 + $0xc4] sm:$0xf0] }
  0x9e   : > { %v2620_v42 = vor.u32 %v3224_v39, %v2619_v37  ;;  %v3271_v39 = vld [vmem:[#allocation11 + $0x34] sm:$0xf0] }
  0x9f   : > { %1339 = vmatpush.bf16.msra.mxu0 %v2652_v29  ;;  %1315 = vmatpush.bf16.msrb.mxu2 %v2600_v41  ;;  %v2715_v29 = vld [vmem:[#allocation10 + $0xf8] sm:$0xf]  ;;  %v3242_v41 = vld [vmem:[#allocation10 + $0xd0] sm:$0xf0] }
  0xa0   : > { %1353 = vmatpush.bf16.msra.mxu1 %v2748_v54  ;;  %v2625_v54 = vld [vmem:[#allocation10 + $0x54] sm:$0xf0]  ;;  %v2716_v31 = vor.u32 %v3248_v30, %v2715_v29 }
  0xa1   : > { %v2628_v56 = vor.u32 %v3225_v53, %v2625_v54 }
  0xa3   : > { %1340 = vmatpush.bf16.msra.mxu0 %v2640_v44  ;;  %1316 = vmatpush.bf16.msrb.mxu2 %v2588_v55  ;;  %v3221_v44 = vld [vmem:[#allocation10 + $0x28] sm:$0xf0]  ;;  %v755_v55 = vperm.slane %v753_v46, 0 }
  0xa4   : > { %1354 = vmatpush.bf16.msra.mxu1 %v2736_v63  ;;  %v2700_v63 = vor.u32 %v3243_v60, %v2697_v61  ;;  %v2608_v47 = vor.u32 %v3221_v44, %v2607_v43  ;;  %v2899_v60 = vld [vmem:[#allocation11 + $0xf0] sm:$0xf]  ;;  %v3276_v43 = vld [vmem:[#allocation11 + $0x64] sm:$0xf]  ;;  %v2829_v44 = vld [vmem:[#allocation11 + $0x68] sm:$0xf0] }
  0xa5   : > { %v2832_v46 = vor.u32 %v3276_v43, %v2829_v44  ;;  %v2939_v43 = vld [vmem:[#allocation11 + $0x140] sm:$0xf]  ;;  %v3305_v44 = vld [vmem:[#allocation11 + $0x144] sm:$0xf0] }
  0xa7   : > { %1341 = vmatpush.bf16.msra.mxu0 %v2628_v56 }
  0xa8   : > { %1355 = vmatpush.bf16.msra.mxu1 %v2724_v36  ;;  %v3245_v36 = vld [vmem:[#allocation10 + $0xe8] sm:$0xf0] }
  0xa9   : > { %v2704_v38 = vor.u32 %v3245_v36, %v2703_v35 }
  0xac   : > { %1356 = vmatpush.bf16.msra.mxu1 %v2712_v48 }
  0xb0   : > { %1357 = vmatpush.bf16.msra.mxu1 %v2700_v63  ;;  %v3295_v63 = vld [vmem:[#allocation11 + $0xf4] sm:$0xf0] }
  0xb1   : > { %v2900_v4 = vor.u32 %v3295_v63, %v2899_v60  ;;  %v3283_v60 = vld [vmem:[#allocation11 + $0x94] sm:$0xf0] }
  0xf3   : > { %v696_v1 = vpop.f32.mrf.mxu0 }
  0xf4   : > { %v710_v5 = vpop.f32.mrf.mxu1  ;;  %v697_v14 = vadd.f32 %v696_v1, %v597_v8  ;;  %v2752_v1 = vor.u32 %v3257_v0, %v2751_v62  ;;  %v2827_v0 = vld [vmem:[#allocation11 + $0x60] sm:$0xf] }
  0xf5   : > { %v711_v16 = vadd.f32 %v710_v5, %v598_v10  ;;  %v2616_v5 = vor.u32 %v3222_v2, %v2613_v3 }
  0xf6   : > { %v715_v21 = vmax.f32 %v697_v14, 0.0  ;;  %v3219_v14 = vld [vmem:[#allocation10 + $0x1c] sm:$0xf] }
  0xf7   : > { %v716_v23 = vmax.f32 %v711_v16, 0.0  ;;  %1342 = vmatpush.bf16.msra.mxu0 %v2616_v5  ;;  %v2655_v16 = vld [vmem:[#allocation10 + $0x80] sm:$0xf] }
  0xf8   : > { %v2891_v5 = vld [vmem:[#allocation11 + $0xe0] sm:$0xf] }
  0xfb   : > { %v698_v17 = vpop.f32.mrf.mxu0 }
  0xfc   : > { %v699_v18 = vadd.f32 %v698_v17, %v597_v8  ;;  %v712_v19 = vpop.f32.mrf.mxu1  ;;  %v3240_v8 = vld [vmem:[#allocation10 + $0xc4] sm:$0xf]  ;;  %v2604_v17 = vor.u32 %v3219_v14, %v2601_v15  ;;  %v2883_v14 = vld [vmem:[#allocation11 + $0xd0] sm:$0xf]  ;;  %v3291_v15 = vld [vmem:[#allocation11 + $0xd4] sm:$0xf0] }
  0xfd   : > { %v713_v20 = vadd.f32 %v712_v19, %v598_v10  ;;  %v2739_v10 = vld [vmem:[#allocation10 + $0x128] sm:$0xf]  ;;  %v2688_v11 = vor.u32 %v3240_v8, %v2685_v9 }
  0xfe   : > { %v717_v22 = vmax.f32 %v699_v18, 0.0  ;;  %v2740_v13 = vor.u32 %v3254_v12, %v2739_v10  ;;  %v3233_v18 = vld [vmem:[#allocation10 + $0x88] sm:$0xf0]  ;;  %1343 = vmatpush.bf16.msra.mxu0 %v2604_v17  ;;  %v2819_v12 = vld [vmem:[#allocation11 + $0x50] sm:$0xf] }
  0xff   : > { %v718_v24 = vmax.f32 %v713_v20, 0.0  ;;  %1358 = vmatpush.bf16.msra.mxu1 %v2688_v11  ;;  %v2656_v19 = vor.u32 %v3233_v18, %v2655_v16  ;;  %v2727_v20 = vld [vmem:[#allocation10 + $0x110] sm:$0xf]  ;;  %v2892_v11 = vor.u32 %v3293_v6, %v2891_v5  ;;  %v3278_v16 = vld [vmem:[#allocation11 + $0x74] sm:$0xf] }
 0x100   : > { %v719_v25 = vpack.c.bf16 %v717_v22, %v715_v21  ;;  %v3251_v21 = vld [vmem:[#allocation10 + $0x118] sm:$0xf0]  ;;  %v3281_v5 = vld [vmem:[#allocation11 + $0x84] sm:$0xf0]  ;;  %v2963_v6 = vld [vmem:[#allocation11 + $0x170] sm:$0xf] }
 0x101   : > { %v720_v26 = vpack.c.bf16 %v718_v24, %v716_v23  ;;  %v2728_v22 = vor.u32 %v3251_v21, %v2727_v20  ;;  %v3216_v23 = vld [vmem:[#allocation10 + $0x4] sm:$0xf]  ;;  %v2589_v24 = vld [vmem:[#allocation10 + $0xc] sm:$0xf0] }
 0x102   : > { %927 = vmatmul.bf16.vlgmr.msra.gmra.mxu2 %v719_v25  ;;  %955 = vmatmul.bf16.vlgmr.msrb.gmra.mxu0 %v719_v25  ;;  %v2643_v25 = vld [vmem:[#allocation10 + $0x68] sm:$0xf] }
 0x103   : > { %941 = vmatmul.bf16.vlgmr.msra.gmra.mxu3 %v720_v26  ;;  %969 = vmatmul.bf16.vlgmr.msrb.gmra.mxu1 %v720_v26  ;;  %v2592_v26 = vor.u32 %v3216_v23, %v2589_v24  ;;  %v2644_v28 = vor.u32 %v3230_v27, %v2643_v25  ;;  %v2811_v27 = vld [vmem:[#allocation11 + $0x40] sm:$0xf] }
 0x104   : > { %1379 = vmatpush.bf16.msra.mxu3 %v2776_v40  ;;  %1365 = vmatpush.bf16.msra.mxu2 %v2680_v59  ;;  %v2691_v40 = vld [vmem:[#allocation10 + $0xc8] sm:$0xf]  ;;  %v3279_v59 = vld [vmem:[#allocation11 + $0x74] sm:$0xf0] }
 0x105   : > { %1344 = vmatpush.bf16.msra.mxu0 %v2592_v26  ;;  %v2692_v45 = vor.u32 %v3242_v41, %v2691_v40  ;;  %v2836_v62 = vor.u32 %v3279_v59, %v2835_v58  ;;  %1710 = vmatpush.bf16.msrb.mxu1 %v2900_v4  ;;  %v2884_v26 = vor.u32 %v3291_v15, %v2883_v14  ;;  %v2867_v40 = vld [vmem:[#allocation11 + $0xb0] sm:$0xf]  ;;  %v2843_v4 = vld [vmem:[#allocation11 + $0x80] sm:$0xf]  ;;  %v2901_v14 = vld [vmem:[#allocation11 + $0xf8] sm:$0xf0] }
 0x106   : > { %v2851_v58 = vld [vmem:[#allocation11 + $0x90] sm:$0xf]  ;;  %v3310_v15 = vld [vmem:[#allocation11 + $0x174] sm:$0xf] }
 0x107   : > { %v2852_v63 = vor.u32 %v3283_v60, %v2851_v58  ;;  %v3302_v60 = vld [vmem:[#allocation11 + $0x134] sm:$0xf] }
 0x108   : > { %1380 = vmatpush.bf16.msra.mxu3 %v2764_v51  ;;  %1366 = vmatpush.bf16.msra.mxu2 %v2668_v7  ;;  %v2595_v51 = vld [vmem:[#allocation10 + $0x8] sm:$0xf] }
 0x109   : > { %v2596_v53 = vor.u32 %v3218_v52, %v2595_v51  ;;  %1696 = vmatpush.bf16.msrb.mxu0 %v2836_v62  ;;  %1711 = vmatpush.bf16.msrb.mxu1 %v2892_v11  ;;  %v3285_v51 = vld [vmem:[#allocation11 + $0xa4] sm:$0xf0]  ;;  %v2813_v62 = vld [vmem:[#allocation11 + $0x48] sm:$0xf0] }
 0x10c   : > { %1381 = vmatpush.bf16.msra.mxu3 %v2752_v1  ;;  %1367 = vmatpush.bf16.msra.mxu2 %v2656_v19  ;;  %v3277_v1 = vld [vmem:[#allocation11 + $0x64] sm:$0xf0]  ;;  %v2837_v19 = vld [vmem:[#allocation11 + $0x78] sm:$0xf0] }
 0x10d   : > { %v2828_v8 = vor.u32 %v3277_v1, %v2827_v0  ;;  %1712 = vmatpush.bf16.msrb.mxu1 %v2884_v26  ;;  %v2779_v1 = vld [vmem:[#allocation11] sm:$0xf] }
 0x10f   : > { %1697 = vmatpush.bf16.msrb.mxu0 %v2828_v8  ;;  %v3311_v8 = vld [vmem:[#allocation11 + $0x174] sm:$0xf0] }
 0x110   : > { %1382 = vmatpush.bf16.msra.mxu3 %v2740_v13  ;;  %1368 = vmatpush.bf16.msra.mxu2 %v2644_v28  ;;  %v3275_v13 = vld [vmem:[#allocation11 + $0x54] sm:$0xf0]  ;;  %v3273_v28 = vld [vmem:[#allocation11 + $0x44] sm:$0xf0]  ;;  %v2964_v11 = vor.u32 %v3311_v8, %v2963_v6  ;;  %v2925_v6 = vld [vmem:[#allocation11 + $0x128] sm:$0xf0] }
 0x111   : > { %v2820_v21 = vor.u32 %v3275_v13, %v2819_v12  ;;  %v2812_v33 = vor.u32 %v3273_v28, %v2811_v27  ;;  %v3294_v13 = vld [vmem:[#allocation11 + $0xf4] sm:$0xf]  ;;  %v3308_v28 = vld [vmem:[#allocation11 + $0x164] sm:$0xf] }
 0x113   : > { %1698 = vmatpush.bf16.msrb.mxu0 %v2820_v21  ;;  %v3268_v21 = vld [vmem:[#allocation11 + $0x24] sm:$0xf] }
 0x114   : > { %1383 = vmatpush.bf16.msra.mxu3 %v2728_v22  ;;  %1369 = vmatpush.bf16.msra.mxu2 %v2632_v34  ;;  %v2840_v22 = vor.u32 %v3278_v16, %v2837_v19  ;;  %v2904_v16 = vor.u32 %v3294_v13, %v2901_v14  ;;  %v2955_v19 = vld [vmem:[#allocation11 + $0x160] sm:$0xf]  ;;  %v2853_v14 = vld [vmem:[#allocation11 + $0x98] sm:$0xf0] }
 0x117   : > { %1699 = vmatpush.bf16.msrb.mxu0 %v2812_v33  ;;  %v3266_v33 = vld [vmem:[#allocation11 + $0x14] sm:$0xf] }
 0x118   : > { %1384 = vmatpush.bf16.msra.mxu3 %v2716_v31  ;;  %1370 = vmatpush.bf16.msra.mxu2 %v2620_v42  ;;  %v2875_v31 = vld [vmem:[#allocation11 + $0xc0] sm:$0xf]  ;;  %v3287_v42 = vld [vmem:[#allocation11 + $0xb4] sm:$0xf0] }
 0x119   : > { %v2876_v36 = vor.u32 %v3289_v32, %v2875_v31  ;;  %v2947_v31 = vld [vmem:[#allocation11 + $0x150] sm:$0xf]  ;;  %v3307_v32 = vld [vmem:[#allocation11 + $0x154] sm:$0xf0] }
 0x11b   : > { %1713 = vmatpush.bf16.msrb.mxu1 %v2876_v36  ;;  %v3290_v36 = vld [vmem:[#allocation11 + $0xd4] sm:$0xf] }
 0x11c   : > { %1385 = vmatpush.bf16.msra.mxu3 %v2704_v38  ;;  %1371 = vmatpush.bf16.msra.mxu2 %v2608_v47  ;;  %v2803_v38 = vld [vmem:[#allocation11 + $0x30] sm:$0xf]  ;;  %v2795_v47 = vld [vmem:[#allocation11 + $0x20] sm:$0xf] }
 0x11d   : > { %v2804_v41 = vor.u32 %v3271_v39, %v2803_v38 }
 0x11f   : > { %1700 = vmatpush.bf16.msrb.mxu0 %v2804_v41  ;;  %v2949_v41 = vld [vmem:[#allocation11 + $0x158] sm:$0xf0] }
 0x120   : > { %1386 = vmatpush.bf16.msra.mxu3 %v2692_v45  ;;  %1372 = vmatpush.bf16.msra.mxu2 %v2596_v53  ;;  %v2868_v45 = vor.u32 %v3287_v42, %v2867_v40  ;;  %v3274_v53 = vld [vmem:[#allocation11 + $0x54] sm:$0xf] }
 0x121   : > { %v3306_v40 = vld [vmem:[#allocation11 + $0x154] sm:$0xf] }
 0x122   : > { %1714 = vmatpush.bf16.msrb.mxu1 %v2868_v45  ;;  %v2952_v42 = vor.u32 %v3306_v40, %v2949_v41  ;;  %v3264_v45 = vld [vmem:[#allocation11 + $0x4] sm:$0xf] }
 0x17f   : > { %v956_v48 = vpop.f32.mrf.mxu0 }
 0x180   : > { %v970_v50 = vpop.f32.mrf.mxu1  ;;  %v957_v54 = vadd.f32 %v956_v48, %v756_v49  ;;  %v3269_v48 = vld [vmem:[#allocation11 + $0x24] sm:$0xf0] }
 0x182   : > { %v971_v2 = vadd.f32 %v970_v50, %v957_v54  ;;  %v2796_v50 = vor.u32 %v3269_v48, %v2795_v47  ;;  %v2821_v54 = vld [vmem:[#allocation11 + $0x58] sm:$0xf0]  ;;  %v2781_v47 = vld [vmem:[#allocation11 + $0x8] sm:$0xf0]  ;;  %v3288_v48 = vld [vmem:[#allocation11 + $0xc4] sm:$0xf] }
 0x184   : > { %v976_v17 = vmax.f32 %v971_v2, 0.0  ;;  %1701 = vmatpush.bf16.msrb.mxu0 %v2796_v50  ;;  %v3265_v2 = vld [vmem:[#allocation11 + $0x4] sm:$0xf0]  ;;  %v2784_v50 = vor.u32 %v3264_v45, %v2781_v47 }
 0x185   : > { %v928_v56 = vpop.f32.mrf.mxu2 }
 0x186   : > { %v942_v57 = vpop.f32.mrf.mxu3  ;;  %v929_v9 = vadd.f32 %v928_v56, %v755_v55  ;;  %v2787_v56 = vld [vmem:[#allocation11 + $0x10] sm:$0xf] }
 0x187   : > { %v958_v61 = vpop.f32.mrf.mxu0 }
 0x188   : > { %v959_v3 = vadd.f32 %v958_v61, %v756_v49  ;;  %v972_v7 = vpop.f32.mrf.mxu1  ;;  %v943_v23 = vadd.f32 %v942_v57, %v929_v9  ;;  %v2859_v49 = vld [vmem:[#allocation11 + $0xa0] sm:$0xf]  ;;  %v3267_v57 = vld [vmem:[#allocation11 + $0x14] sm:$0xf0]  ;;  %v3272_v61 = vld [vmem:[#allocation11 + $0x44] sm:$0xf] }
 0x189   : > { %v2860_v52 = vor.u32 %v3285_v51, %v2859_v49  ;;  %v2788_v59 = vor.u32 %v3267_v57, %v2787_v56  ;;  %v2816_v0 = vor.u32 %v3272_v61, %v2813_v62  ;;  %v3270_v9 = vld [vmem:[#allocation11 + $0x34] sm:$0xf]  ;;  %v2877_v49 = vld [vmem:[#allocation11 + $0xc8] sm:$0xf0]  ;;  %v3303_v56 = vld [vmem:[#allocation11 + $0x134] sm:$0xf0] }
 0x18a   : > { %v973_v10 = vadd.f32 %v972_v7, %v959_v3  ;;  %v975_v34 = vmax.f32 %v943_v23, 0.0  ;;  %v2780_v3 = vor.u32 %v3265_v2, %v2779_v1  ;;  %v2844_v7 = vor.u32 %v3281_v5, %v2843_v4  ;;  %v2797_v23 = vld [vmem:[#allocation11 + $0x28] sm:$0xf0]  ;;  %v3286_v57 = vld [vmem:[#allocation11 + $0xb4] sm:$0xf] }
 0x18b   : > { %1715 = vmatpush.bf16.msrb.mxu1 %v2860_v52  ;;  %1702 = vmatpush.bf16.msrb.mxu0 %v2788_v59  ;;  %v2800_v26 = vor.u32 %v3268_v21, %v2797_v23  ;;  %v2880_v51 = vor.u32 %v3288_v48, %v2877_v49  ;;  %v3304_v52 = vld [vmem:[#allocation11 + $0x144] sm:$0xf]  ;;  %v2869_v59 = vld [vmem:[#allocation11 + $0xb8] sm:$0xf0]  ;;  %v3301_v1 = vld [vmem:[#allocation11 + $0x124] sm:$0xf0] }
 0x18c   : > { %v978_v18 = vmax.f32 %v973_v10, 0.0  ;;  %v2805_v10 = vld [vmem:[#allocation11 + $0x38] sm:$0xf0]  ;;  %v2872_v62 = vor.u32 %v3286_v57, %v2869_v59  ;;  %v3284_v2 = vld [vmem:[#allocation11 + $0xa4] sm:$0xf] }
 0x18d   : > { %v930_v20 = vpop.f32.mrf.mxu2  ;;  %v2808_v12 = vor.u32 %v3270_v9, %v2805_v10  ;;  %v2933_v61 = vld [vmem:[#allocation11 + $0x138] sm:$0xf0]  ;;  %v2861_v4 = vld [vmem:[#allocation11 + $0xa8] sm:$0xf0]  ;;  %v3300_v5 = vld [vmem:[#allocation11 + $0x124] sm:$0xf] }
 0x18e   : > { %v980_v24 = vpack.c.bf16 %v978_v18, %v976_v17  ;;  %v931_v25 = vadd.f32 %v930_v20, %v755_v55  ;;  %v944_v29 = vpop.f32.mrf.mxu3  ;;  %v2824_v55 = vor.u32 %v3274_v53, %v2821_v54  ;;  %v2965_v17 = vld [vmem:[#allocation11 + $0x178] sm:$0xf0]  ;;  %v3309_v20 = vld [vmem:[#allocation11 + $0x164] sm:$0xf0]  ;;  %v2941_v53 = vld [vmem:[#allocation11 + $0x148] sm:$0xf0]  ;;  %v2928_v8 = vor.u32 %v3300_v5, %v2925_v6 }
 0x18f   : > { %1716 = vmatpush.bf16.msrb.mxu1 %v2852_v63  ;;  %1703 = vmatpush.bf16.msrb.mxu0 %v2780_v3  ;;  %v2968_v18 = vor.u32 %v3310_v15, %v2965_v17  ;;  %v2944_v54 = vor.u32 %v3304_v52, %v2941_v53  ;;  %v2936_v63 = vor.u32 %v3302_v60, %v2933_v61  ;;  %v1045_v9 = vld [vmem:[%s4131_s6] sm:$0x7]  ;;  %v3298_v15 = vld [vmem:[#allocation11 + $0x114] sm:$0xf]  ;;  %v2907_v23 = vld [vmem:[#allocation11 + $0x100] sm:$0xf] }
 0x190   : > { %v945_v30 = vadd.f32 %v944_v29, %v931_v25  ;;  %1331 = vmatmul.bf16.vlgmr.msrb.gmra.mxu3 %v980_v24  ;;  %1359 = vmatmul.bf16.vlgmr.msra.gmra.mxu1 %v980_v24  ;;  %v2893_v25 = vld [vmem:[#allocation11 + $0xe8] sm:$0xf0]  ;;  %v2915_v10 = vld [vmem:[#allocation11 + $0x110] sm:$0xf]  ;;  %v1048_v21 = vperm.slane %v1045_v9, 1 }
 0x191   : > { %1738 = vmatpush.bf16.msrb.mxu3 %v2840_v22  ;;  %v2956_v22 = vor.u32 %v3309_v20, %v2955_v19  ;;  %v2957_v29 = vld [vmem:[#allocation11 + $0x168] sm:$0xf0]  ;;  %v3027_v6 = vld [vmem:[#allocation13 + $0x70] sm:$0xf] }
 0x192   : > { %v977_v35 = vmax.f32 %v945_v30, 0.0  ;;  %v2960_v30 = vor.u32 %v3308_v28, %v2957_v29  ;;  %v3296_v28 = vld [vmem:[#allocation11 + $0x104] sm:$0xf]  ;;  %v2909_v29 = vld [vmem:[#allocation11 + $0x108] sm:$0xf0] }
 0x193   : > { %1717 = vmatpush.bf16.msrb.mxu1 %v2844_v7  ;;  %v2864_v7 = vor.u32 %v3284_v2, %v2861_v4  ;;  %v3342_v2 = vld [vmem:[#allocation13 + $0xf4] sm:$0xf]  ;;  %v3093_v4 = vld [vmem:[#allocation13 + $0xf8] sm:$0xf0] }
 0x194   : > { %v979_v37 = vpack.c.bf16 %v977_v35, %v975_v34  ;;  %v2948_v34 = vor.u32 %v3307_v32, %v2947_v31  ;;  %v2789_v35 = vld [vmem:[#allocation11 + $0x18] sm:$0xf0]  ;;  %v2912_v31 = vor.u32 %v3296_v28, %v2909_v29  ;;  %v3096_v5 = vor.u32 %v3342_v2, %v3093_v4  ;;  %v2987_v2 = vld [vmem:[#allocation13 + $0x20] sm:$0xf]  ;;  %v3043_v4 = vld [vmem:[#allocation13 + $0x90] sm:$0xf] }
 0x195   : > { %1739 = vmatpush.bf16.msrb.mxu3 %v2832_v46  ;;  %v2792_v38 = vor.u32 %v3266_v33, %v2789_v35  ;;  %v2940_v46 = vor.u32 %v3305_v44, %v2939_v43  ;;  %v3077_v28 = vld [vmem:[#allocation13 + $0xd8] sm:$0xf0] }
 0x196   : > { %1317 = vmatmul.bf16.vlgmr.msrb.gmra.mxu2 %v979_v37  ;;  %1345 = vmatmul.bf16.vlgmr.msra.gmra.mxu0 %v979_v37 }
 0x197   : > { %1724 = vmatpush.bf16.msrb.mxu2 %v2964_v11  ;;  %1752 = vmatpush.bf16.msra.mxu0 %v2904_v16  ;;  %v3299_v11 = vld [vmem:[#allocation11 + $0x114] sm:$0xf0]  ;;  %v2917_v16 = vld [vmem:[#allocation11 + $0x118] sm:$0xf0] }
 0x198   : > { %1766 = vmatpush.bf16.msra.mxu1 %v2968_v18  ;;  %v2916_v13 = vor.u32 %v3299_v11, %v2915_v10  ;;  %v2920_v20 = vor.u32 %v3298_v15, %v2917_v16  ;;  %v3341_v10 = vld [vmem:[#allocation13 + $0xe4] sm:$0xf0]  ;;  %v3326_v11 = vld [vmem:[#allocation13 + $0x74] sm:$0xf]  ;;  %v3340_v15 = vld [vmem:[#allocation13 + $0xe4] sm:$0xf] }
 0x199   : > { %1740 = vmatpush.bf16.msrb.mxu3 %v2824_v55  ;;  %v2931_v55 = vld [vmem:[#allocation11 + $0x130] sm:$0xf]  ;;  %v3085_v16 = vld [vmem:[#allocation13 + $0xe8] sm:$0xf0] }
 0x19a   : > { %v2932_v58 = vor.u32 %v3303_v56, %v2931_v55 }
 0x19b   : > { %1725 = vmatpush.bf16.msrb.mxu2 %v2956_v22 }
 0x19c   : > { %1767 = vmatpush.bf16.msra.mxu1 %v2960_v30 }
 0x19d   : > { %1741 = vmatpush.bf16.msrb.mxu3 %v2816_v0  ;;  %v2923_v0 = vld [vmem:[#allocation11 + $0x120] sm:$0xf] }
 0x19e   : > { %v2924_v3 = vor.u32 %v3301_v1, %v2923_v0  ;;  %v3091_v0 = vld [vmem:[#allocation13 + $0xf0] sm:$0xf]  ;;  %v3343_v1 = vld [vmem:[#allocation13 + $0xf4] sm:$0xf0] }
 0x19f   : > { %1726 = vmatpush.bf16.msrb.mxu2 %v2948_v34  ;;  %v1047_v34 = vperm.slane %v1045_v9, 0 }
 0x1a0   : > { %1387 = vmatmul.bf16.vlgmr.msra.gmra.mxu3 %v980_v24  ;;  %v3292_v24 = vld [vmem:[#allocation11 + $0xe4] sm:$0xf]  ;;  %1768 = vmatpush.bf16.msra.mxu1 %v2952_v42 }
 0x1a1   : > { %1742 = vmatpush.bf16.msrb.mxu3 %v2808_v12  ;;  %v2896_v27 = vor.u32 %v3292_v24, %v2893_v25  ;;  %v3282_v12 = vld [vmem:[#allocation11 + $0x94] sm:$0xf]  ;;  %v3297_v24 = vld [vmem:[#allocation11 + $0x104] sm:$0xf0]  ;;  %v3280_v25 = vld [vmem:[#allocation11 + $0x84] sm:$0xf] }
 0x1a2   : > { %v2856_v19 = vor.u32 %v3282_v12, %v2853_v14  ;;  %v3029_v12 = vld [vmem:[#allocation13 + $0x78] sm:$0xf0] }
 0x1a3   : > { %1753 = vmatpush.bf16.msra.mxu0 %v2896_v27  ;;  %1727 = vmatpush.bf16.msrb.mxu2 %v2940_v46  ;;  %v2845_v27 = vld [vmem:[#allocation11 + $0x88] sm:$0xf0]  ;;  %v3032_v14 = vor.u32 %v3326_v11, %v3029_v12  ;;  %v3330_v11 = vld [vmem:[#allocation13 + $0x94] sm:$0xf]  ;;  %v3045_v12 = vld [vmem:[#allocation13 + $0x98] sm:$0xf0] }
 0x1a4   : > { %1769 = vmatpush.bf16.msra.mxu1 %v2944_v54  ;;  %v2848_v30 = vor.u32 %v3280_v25, %v2845_v27  ;;  %v1049_v54 = vperm.slane %v1045_v9, 2  ;;  %v3338_v27 = vld [vmem:[#allocation13 + $0xd4] sm:$0xf] }
 0x1a5   : > { %1743 = vmatpush.bf16.msrb.mxu3 %v2800_v26  ;;  %v2908_v26 = vor.u32 %v3297_v24, %v2907_v23  ;;  %v3324_v23 = vld [vmem:[#allocation13 + $0x64] sm:$0xf]  ;;  %v3021_v24 = vld [vmem:[#allocation13 + $0x68] sm:$0xf0]  ;;  %v3080_v29 = vor.u32 %v3338_v27, %v3077_v28  ;;  %v2971_v28 = vld [vmem:[#allocation13] sm:$0xf] }
 0x1a6   : > { %1373 = vmatmul.bf16.vlgmr.msra.gmra.mxu2 %v979_v37  ;;  %v2885_v37 = vld [vmem:[#allocation11 + $0xd8] sm:$0xf0] }
 0x1a7   : > { %v2888_v39 = vor.u32 %v3290_v36, %v2885_v37  ;;  %1728 = vmatpush.bf16.msrb.mxu2 %v2932_v58 }
 0x1a8   : > { %1770 = vmatpush.bf16.msra.mxu1 %v2936_v63 }
 0x1a9   : > { %1744 = vmatpush.bf16.msrb.mxu3 %v2792_v38  ;;  %1754 = vmatpush.bf16.msra.mxu0 %v2888_v39 }
 0x1ab   : > { %1729 = vmatpush.bf16.msrb.mxu2 %v2924_v3  ;;  %v3092_v3 = vor.u32 %v3343_v1, %v3091_v0  ;;  %v3053_v0 = vld [vmem:[#allocation13 + $0xa8] sm:$0xf0] }
 0x1ac   : > { %1771 = vmatpush.bf16.msra.mxu1 %v2928_v8  ;;  %v3083_v8 = vld [vmem:[#allocation13 + $0xe0] sm:$0xf] }
 0x1ad   : > { %1745 = vmatpush.bf16.msrb.mxu3 %v2784_v50  ;;  %1755 = vmatpush.bf16.msra.mxu0 %v2880_v51 }
 0x1af   : > { %1730 = vmatpush.bf16.msrb.mxu2 %v2916_v13  ;;  %v3084_v13 = vor.u32 %v3341_v10, %v3083_v8  ;;  %v2989_v8 = vld [vmem:[#allocation13 + $0x28] sm:$0xf0] }
 0x1b0   : > { %1772 = vmatpush.bf16.msra.mxu1 %v2920_v20  ;;  %v3075_v20 = vld [vmem:[#allocation13 + $0xd0] sm:$0xf] }
 0x1b1   : > { %1756 = vmatpush.bf16.msra.mxu0 %v2872_v62  ;;  %1998 = vmatpush.bf16.msra.mxu3 %v3092_v3  ;;  %v3317_v3 = vld [vmem:[#allocation13 + $0x24] sm:$0xf0] }
 0x1b3   : > { %1731 = vmatpush.bf16.msrb.mxu2 %v2908_v26  ;;  %v3024_v26 = vor.u32 %v3324_v23, %v3021_v24  ;;  %v3328_v23 = vld [vmem:[#allocation13 + $0x84] sm:$0xf]  ;;  %v3037_v24 = vld [vmem:[#allocation13 + $0x88] sm:$0xf0] }
 0x1b4   : > { %1773 = vmatpush.bf16.msra.mxu1 %v2912_v31  ;;  %v3323_v31 = vld [vmem:[#allocation13 + $0x54] sm:$0xf0] }
 0x1b5   : > { %1757 = vmatpush.bf16.msra.mxu0 %v2864_v7  ;;  %v3327_v7 = vld [vmem:[#allocation13 + $0x74] sm:$0xf0]  ;;  %1999 = vmatpush.bf16.msra.mxu3 %v3084_v13  ;;  %v3048_v13 = vor.u32 %v3330_v11, %v3045_v12  ;;  %v3353_v12 = vld [vmem:[#allocation14 + $0x48] sm:$0xff] }
 0x1b6   : > { %v3028_v9 = vor.u32 %v3327_v7, %v3027_v6  ;;  %v3331_v6 = vld [vmem:[#allocation13 + $0x94] sm:$0xf0]  ;;  %v3316_v7 = vld [vmem:[#allocation13 + $0x24] sm:$0xf] }
 0x1b7   : > { %v2992_v10 = vor.u32 %v3316_v7, %v2989_v8  ;;  %v3349_v7 = vld [vmem:[#allocation14 + $0x28] sm:$0xff]  ;;  %v3355_v8 = vld [vmem:[#allocation14 + $0x58] sm:$0xff] }
 0x1b8   : > { %1984 = vmatpush.bf16.msra.mxu2 %v3028_v9  ;;  %v3044_v9 = vor.u32 %v3331_v6, %v3043_v4  ;;  %v3356_v6 = vld [vmem:[#allocation14 + $0x60] sm:$0xff]  ;;  %v3347_v11 = vld [vmem:[#allocation14 + $0x18] sm:$0xff] }
 0x1b9   : > { %1758 = vmatpush.bf16.msra.mxu0 %v2856_v19  ;;  %v3325_v19 = vld [vmem:[#allocation13 + $0x64] sm:$0xf0] }
 0x1bd   : > { %1759 = vmatpush.bf16.msra.mxu0 %v2848_v30  ;;  %v3011_v30 = vld [vmem:[#allocation13 + $0x50] sm:$0xf] }
 0x20d   : > { %v1360_v17 = vpop.f32.mrf.mxu1 }
 0x213   : > { %v1346_v18 = vpop.f32.mrf.mxu0  ;;  %v1332_v22 = vpop.f32.mrf.mxu3 }
 0x214   : > { %v1347_v32 = vadd.f32 %v1346_v18, %v1048_v21  ;;  %v3019_v18 = vld [vmem:[#allocation13 + $0x60] sm:$0xf] }
 0x215   : > { %v1362_v38 = vpop.f32.mrf.mxu1 }
 0x216   : > { %v1361_v36 = vadd.f32 %v1360_v17, %v1347_v32  ;;  %v3088_v17 = vor.u32 %v3340_v15, %v3085_v16  ;;  %v3067_v32 = vld [vmem:[#allocation13 + $0xc0] sm:$0xf]  ;;  %v3315_v15 = vld [vmem:[#allocation13 + $0x14] sm:$0xf0] }
 0x217   : > { %v3035_v16 = vld [vmem:[#allocation13 + $0x80] sm:$0xf] }
 0x218   : > { %v1394_v42 = vmax.f32 %v1361_v36, 0.0  ;;  %v3013_v36 = vld [vmem:[#allocation13 + $0x58] sm:$0xf0] }
 0x219   : > { %v1318_v33 = vpop.f32.mrf.mxu2 }
 0x21a   : > { %v1319_v39 = vadd.f32 %v1318_v33, %v1047_v34  ;;  %v3012_v33 = vor.u32 %v3323_v31, %v3011_v30  ;;  %v3312_v30 = vld [vmem:[#allocation13 + $0x4] sm:$0xf] }
 0x21b   : > { %v1348_v35 = vpop.f32.mrf.mxu0  ;;  %v1334_v41 = vpop.f32.mrf.mxu3 }
 0x21c   : > { %v1349_v37 = vadd.f32 %v1348_v35, %v1048_v21  ;;  %v1333_v45 = vadd.f32 %v1332_v22, %v1319_v39  ;;  %v3020_v21 = vor.u32 %v3325_v19, %v3019_v18  ;;  %v3339_v22 = vld [vmem:[#allocation13 + $0xd4] sm:$0xf0]  ;;  %v3322_v35 = vld [vmem:[#allocation13 + $0x54] sm:$0xf]  ;;  %v3336_v39 = vld [vmem:[#allocation13 + $0xc4] sm:$0xf] }
 0x21d   : > { %v3076_v25 = vor.u32 %v3339_v22, %v3075_v20  ;;  %v3329_v18 = vld [vmem:[#allocation13 + $0x84] sm:$0xf0]  ;;  %v3314_v19 = vld [vmem:[#allocation13 + $0x14] sm:$0xf]  ;;  %v2981_v20 = vld [vmem:[#allocation13 + $0x18] sm:$0xf0] }
 0x21e   : > { %v1363_v40 = vadd.f32 %v1362_v38, %v1349_v37  ;;  %v1393_v49 = vmax.f32 %v1333_v45, 0.0  ;;  %1985 = vmatpush.bf16.msra.mxu2 %v3020_v21  ;;  %v3016_v38 = vor.u32 %v3322_v35, %v3013_v36  ;;  %v3036_v21 = vor.u32 %v3329_v18, %v3035_v16  ;;  %v3351_v35 = vld [vmem:[#allocation14 + $0x38] sm:$0xff]  ;;  %v3358_v36 = vld [vmem:[#allocation14 + $0x70] sm:$0xff]  ;;  %v3344_v16 = vld [vmem:[#allocation14] sm:$0xff] }
 0x21f   : > { %2000 = vmatpush.bf16.msra.mxu3 %v3076_v25  ;;  %v2984_v22 = vor.u32 %v3314_v19, %v2981_v20 }
 0x220   : > { %v1397_v43 = vmax.f32 %v1363_v40, 0.0  ;;  %v3069_v40 = vld [vmem:[#allocation13 + $0xc8] sm:$0xf0] }
 0x221   : > { %v1320_v44 = vpop.f32.mrf.mxu2 }
 0x222   : > { %v1400_v46 = vpack.c.bf16 %v1397_v43, %v1394_v42  ;;  %v1321_v47 = vadd.f32 %v1320_v44, %v1047_v34  ;;  %v3337_v34 = vld [vmem:[#allocation13 + $0xc4] sm:$0xf0]  ;;  %1986 = vmatpush.bf16.msra.mxu2 %v3012_v33  ;;  %v3003_v42 = vld [vmem:[#allocation13 + $0x40] sm:$0xf]  ;;  %v3059_v44 = vld [vmem:[#allocation13 + $0xb0] sm:$0xf] }
 0x223   : > { %v1388_v52 = vpop.f32.mrf.mxu3  ;;  %v3068_v37 = vor.u32 %v3337_v34, %v3067_v32  ;;  %v3321_v43 = vld [vmem:[#allocation13 + $0x44] sm:$0xf0]  ;;  %v2973_v32 = vld [vmem:[#allocation13 + $0x8] sm:$0xf0]  ;;  %v3359_v34 = vld [vmem:[#allocation14 + $0x78] sm:$0xff] }
 0x224   : > { %v1335_v48 = vadd.f32 %v1334_v41, %v1321_v47  ;;  %1718 = vmatmul.bf16.vlgmr.msrb.gmra.mxu1 %v1400_v46  ;;  %v3072_v41 = vor.u32 %v3336_v39, %v3069_v40  ;;  %v3004_v45 = vor.u32 %v3321_v43, %v3003_v42  ;;  %v3320_v47 = vld [vmem:[#allocation13 + $0x44] sm:$0xf]  ;;  %v2976_v33 = vor.u32 %v3312_v30, %v2973_v32  ;;  %v3357_v40 = vld [vmem:[#allocation14 + $0x68] sm:$0xff] }
 0x225   : > { %2026 = vmatpush.bf16.msrb.mxu1 %v3096_v5  ;;  %2001 = vmatpush.bf16.msra.mxu3 %v3068_v37  ;;  %v2988_v5 = vor.u32 %v3317_v3, %v2987_v2 }
 0x226   : > { %v1396_v50 = vmax.f32 %v1335_v48, 0.0  ;;  %v3005_v48 = vld [vmem:[#allocation13 + $0x48] sm:$0xf0]  ;;  %1987 = vmatpush.bf16.msra.mxu2 %v3004_v45 }
 0x228   : > { %v1399_v51 = vpack.c.bf16 %v1396_v50, %v1393_v49  ;;  %v3008_v50 = vor.u32 %v3320_v47, %v3005_v48 }
 0x229   : > { %v1374_v53 = vpop.f32.mrf.mxu2  ;;  %2027 = vmatpush.bf16.msrb.mxu1 %v3088_v17 }
 0x22a   : > { %1704 = vmatmul.bf16.vlgmr.msrb.gmra.mxu0 %v1399_v51  ;;  %1746 = vmatmul.bf16.vlgmr.msrb.gmra.mxu3 %v1399_v51  ;;  %v1375_v55 = vadd.f32 %v1374_v53, %v1049_v54  ;;  %v3334_v51 = vld [vmem:[#allocation13 + $0xb4] sm:$0xf] }
 0x22b   : > { %v1390_v59 = vpop.f32.mrf.mxu3  ;;  %2012 = vmatpush.bf16.msrb.mxu0 %v3032_v14  ;;  %v2979_v14 = vld [vmem:[#allocation13 + $0x10] sm:$0xf] }
 0x22c   : > { %v1389_v57 = vadd.f32 %v1388_v52, %v1375_v55  ;;  %v3061_v52 = vld [vmem:[#allocation13 + $0xb8] sm:$0xf0]  ;;  %v3319_v55 = vld [vmem:[#allocation13 + $0x34] sm:$0xf0]  ;;  %v2980_v17 = vor.u32 %v3315_v15, %v2979_v14  ;;  %v3352_v14 = vld [vmem:[#allocation14 + $0x40] sm:$0xff] }
 0x22d   : > { %2028 = vmatpush.bf16.msrb.mxu1 %v3080_v29  ;;  %v3064_v53 = vor.u32 %v3334_v51, %v3061_v52  ;;  %v3313_v29 = vld [vmem:[#allocation13 + $0x4] sm:$0xf0] }
 0x22e   : > { %v1395_v61 = vmax.f32 %v1389_v57, 0.0  ;;  %v2972_v31 = vor.u32 %v3313_v29, %v2971_v28  ;;  %v3345_v15 = vld [vmem:[#allocation14 + $0x8] sm:$0xff] }
 0x22f   : > { %2013 = vmatpush.bf16.msrb.mxu0 %v3024_v26  ;;  %v3040_v26 = vor.u32 %v3328_v23, %v3037_v24 }
 0x231   : > { %v1376_v56 = vpop.f32.mrf.mxu2  ;;  %2029 = vmatpush.bf16.msrb.mxu1 %v3072_v41  ;;  %v1450_v41 = vld [vmem:[%s4133_s8] sm:$0x3] }
 0x232   : > { %v1377_v58 = vadd.f32 %v1376_v56, %v1049_v54  ;;  %v2995_v54 = vld [vmem:[#allocation13 + $0x30] sm:$0xf]  ;;  %v3051_v56 = vld [vmem:[#allocation13 + $0xa0] sm:$0xf]  ;;  %v1453_v42 = vperm.slane %v1450_v41, 1  ;;  %v1452_v45 = vperm.slane %v1450_v41, 0 }
 0x233   : > { %2014 = vmatpush.bf16.msrb.mxu0 %v3016_v38  ;;  %v2996_v57 = vor.u32 %v3319_v55, %v2995_v54 }
 0x234   : > { %v1391_v60 = vadd.f32 %v1390_v59, %v1377_v58  ;;  %v3333_v58 = vld [vmem:[#allocation13 + $0xa4] sm:$0xf0]  ;;  %v3318_v59 = vld [vmem:[#allocation13 + $0x34] sm:$0xf] }
 0x235   : > { %2030 = vmatpush.bf16.msrb.mxu1 %v3064_v53  ;;  %1988 = vmatpush.bf16.msra.mxu2 %v2996_v57 }
 0x236   : > { %v1398_v62 = vmax.f32 %v1391_v60, 0.0  ;;  %v2997_v60 = vld [vmem:[#allocation13 + $0x38] sm:$0xf0] }
 0x237   : > { %2015 = vmatpush.bf16.msrb.mxu0 %v3008_v50 }
 0x238   : > { %v1401_v63 = vpack.c.bf16 %v1398_v62, %v1395_v61  ;;  %v3052_v61 = vor.u32 %v3333_v58, %v3051_v56  ;;  %v3000_v62 = vor.u32 %v3318_v59, %v2997_v60 }
 0x239   : > { %1989 = vmatpush.bf16.msra.mxu2 %v2988_v5  ;;  %v3350_v5 = vld [vmem:[#allocation14 + $0x30] sm:$0xff] }
 0x23a   : > { %1732 = vmatmul.bf16.vlgmr.msrb.gmra.mxu2 %v1401_v63  ;;  %1760 = vmatmul.bf16.vlgmr.msra.gmra.mxu0 %v1400_v46  ;;  %v3335_v46 = vld [vmem:[#allocation13 + $0xb4] sm:$0xf0] }
 0x23b   : > { %1774 = vmatmul.bf16.vlgmr.msra.gmra.mxu1 %v1401_v63  ;;  %v3060_v49 = vor.u32 %v3335_v46, %v3059_v44  ;;  %v3332_v63 = vld [vmem:[#allocation13 + $0xa4] sm:$0xf]  ;;  %2016 = vmatpush.bf16.msrb.mxu0 %v3000_v62 }
 0x23c   : > { %v3056_v1 = vor.u32 %v3332_v63, %v3053_v0 }
 0x23d   : > { %2002 = vmatpush.bf16.msra.mxu3 %v3060_v49  ;;  %1990 = vmatpush.bf16.msra.mxu2 %v2980_v17  ;;  %v1818_v17 = vld [vmem:[%s4135_s10] sm:$0x3] }
 0x23e   : > { %2031 = vmatpush.bf16.msrb.mxu1 %v3056_v1  ;;  %v1821_v20 = vperm.slane %v1818_v17, 1  ;;  %v1820_v24 = vperm.slane %v1818_v17, 0 }
 0x23f   : > { %2017 = vmatpush.bf16.msrb.mxu0 %v2992_v10  ;;  %v3354_v10 = vld [vmem:[#allocation14 + $0x50] sm:$0xff] }
 0x241   : > { %2003 = vmatpush.bf16.msra.mxu3 %v3052_v61  ;;  %1991 = vmatpush.bf16.msra.mxu2 %v2972_v31 }
 0x242   : > { %2032 = vmatpush.bf16.msrb.mxu1 %v3048_v13  ;;  %v3346_v13 = vld [vmem:[#allocation14 + $0x10] sm:$0xff] }
 0x243   : > { %2018 = vmatpush.bf16.msrb.mxu0 %v2984_v22 }
 0x245   : > { %2004 = vmatpush.bf16.msra.mxu3 %v3044_v9  ;;  %2178 = vmatpush.bf16.msrb.mxu2 %v3351_v35  ;;  %v3348_v9 = vld [vmem:[#allocation14 + $0x20] sm:$0xff] }
 0x246   : > { %2033 = vmatpush.bf16.msrb.mxu1 %v3040_v26 }
 0x247   : > { %2019 = vmatpush.bf16.msrb.mxu0 %v2976_v33 }
 0x249   : > { %2005 = vmatpush.bf16.msra.mxu3 %v3036_v21  ;;  %2179 = vmatpush.bf16.msrb.mxu2 %v3350_v5 }
 0x24d   : > { %2192 = vmatpush.bf16.msrb.mxu3 %v3359_v34  ;;  %2180 = vmatpush.bf16.msrb.mxu2 %v3349_v7 }
 0x251   : > { %2193 = vmatpush.bf16.msrb.mxu3 %v3358_v36  ;;  %2181 = vmatpush.bf16.msrb.mxu2 %v3348_v9 }
 0x255   : > { %2194 = vmatpush.bf16.msrb.mxu3 %v3357_v40  ;;  %2182 = vmatpush.bf16.msrb.mxu2 %v3347_v11 }
 0x259   : > { %2195 = vmatpush.bf16.msrb.mxu3 %v3356_v6  ;;  %2183 = vmatpush.bf16.msrb.mxu2 %v3346_v13 }
 0x25d   : > { %2196 = vmatpush.bf16.msrb.mxu3 %v3355_v8  ;;  %2184 = vmatpush.bf16.msrb.mxu2 %v3345_v15 }
 0x261   : > { %2197 = vmatpush.bf16.msrb.mxu3 %v3354_v10  ;;  %2185 = vmatpush.bf16.msrb.mxu2 %v3344_v16 }
 0x265   : > { %2198 = vmatpush.bf16.msrb.mxu3 %v3353_v12 }
 0x269   : > { %2199 = vmatpush.bf16.msrb.mxu3 %v3352_v14 }
 0x2a1   : > { %v1719_v25 = vpop.f32.mrf.mxu1 }
 0x2a7   : > { %v1705_v27 = vpop.f32.mrf.mxu0 }
 0x2a8   : > { %v1706_v50 = vadd.f32 %v1705_v27, %v1452_v45 }
 0x2a9   : > { %v1721_v38 = vpop.f32.mrf.mxu1 }
 0x2aa   : > { %v1720_v57 = vadd.f32 %v1719_v25, %v1706_v50 }
 0x2ad   : > { %v1747_v39 = vpop.f32.mrf.mxu3 }
 0x2ae   : > { %v1748_v46 = vadd.f32 %v1747_v39, %v1453_v42 }
 0x2af   : > { %v1707_v37 = vpop.f32.mrf.mxu0 }
 0x2b0   : > { %v1708_v53 = vadd.f32 %v1707_v37, %v1452_v45 }
 0x2b2   : > { %v1722_v62 = vadd.f32 %v1721_v38, %v1708_v53 }
 0x2b5   : > { %v1749_v47 = vpop.f32.mrf.mxu3 }
 0x2b6   : > { %v1750_v51 = vadd.f32 %v1749_v47, %v1453_v42 }
 0x2b7   : > { %v1761_v43 = vpop.f32.mrf.mxu0 }
 0x2b8   : > { %v1775_v44 = vpop.f32.mrf.mxu1  ;;  %v1762_v48 = vadd.f32 %v1761_v43, %v1748_v46 }
 0x2ba   : > { %v1776_v54 = vadd.f32 %v1775_v44, %v1762_v48  ;;  %v3491_v44 = vld [vmem:[%s4137_s12] ss:$0 sm:$0xff] }
 0x2bc   : > { %v1781_v59 = vmax.f32 %v1776_v54, 0.0 }
 0x2bd   : > { %v1733_v49 = vpop.f32.mrf.mxu2 }
 0x2be   : > { %v1734_v60 = vadd.f32 %v1733_v49, %v1720_v57 }
 0x2bf   : > { %v1763_v52 = vpop.f32.mrf.mxu0 }
 0x2c0   : > { %v1764_v55 = vadd.f32 %v1763_v52, %v1750_v51  ;;  %v1777_v56 = vpop.f32.mrf.mxu1  ;;  %v1780_v2 = vmax.f32 %v1734_v60, 0.0 }
 0x2c2   : > { %v1778_v58 = vadd.f32 %v1777_v56, %v1764_v55 }
 0x2c4   : > { %v1783_v61 = vmax.f32 %v1778_v58, 0.0 }
 0x2c5   : > { %v1735_v63 = vpop.f32.mrf.mxu2 }
 0x2c6   : > { %v1785_v0 = vpack.c.bf16 %v1783_v61, %v1781_v59  ;;  %v1736_v1 = vadd.f32 %v1735_v63, %v1722_v62 }
 0x2c8   : > { %v1782_v3 = vmax.f32 %v1736_v1, 0.0  ;;  %2006 = vmatmul.bf16.vlgmr.msra.gmra.mxu3 %v1785_v0  ;;  %2034 = vmatmul.bf16.vlgmr.msrb.gmra.mxu1 %v1785_v0 }
 0x2ca   : > { %v1784_v4 = vpack.c.bf16 %v1782_v3, %v1780_v2 }
 0x2cc   : > { %1992 = vmatmul.bf16.vlgmr.msra.gmra.mxu2 %v1784_v4  ;;  %2020 = vmatmul.bf16.vlgmr.msrb.gmra.mxu0 %v1784_v4 }
 0x345   : > { %v2035_v18 = vpop.f32.mrf.mxu1 }
 0x349   : > { %v2021_v19 = vpop.f32.mrf.mxu0 }
 0x34a   : > { %v2022_v21 = vadd.f32 %v2021_v19, %v1821_v20 }
 0x34b   : > { %v2007_v22 = vpop.f32.mrf.mxu3 }
 0x34c   : > { %v2036_v26 = vadd.f32 %v2035_v18, %v2022_v21 }
 0x34d   : > { %v2037_v28 = vpop.f32.mrf.mxu1 }
 0x34e   : > { %v2041_v31 = vmax.f32 %v2036_v26, 0.0 }
 0x34f   : > { %v1993_v23 = vpop.f32.mrf.mxu2 }
 0x350   : > { %v1994_v29 = vadd.f32 %v1993_v23, %v1820_v24 }
 0x351   : > { %v2023_v25 = vpop.f32.mrf.mxu0 }
 0x352   : > { %v2024_v27 = vadd.f32 %v2023_v25, %v1821_v20  ;;  %v2008_v34 = vadd.f32 %v2007_v22, %v1994_v29 }
 0x353   : > { %v2009_v37 = vpop.f32.mrf.mxu3 }
 0x354   : > { %v2038_v30 = vadd.f32 %v2037_v28, %v2024_v27  ;;  %v2040_v39 = vmax.f32 %v2008_v34, 0.0 }
 0x356   : > { %v2043_v32 = vmax.f32 %v2038_v30, 0.0 }
 0x357   : > { %v1995_v33 = vpop.f32.mrf.mxu2 }
 0x358   : > { %v2045_v35 = vpack.c.bf16 %v2043_v32, %v2041_v31  ;;  %v1996_v36 = vadd.f32 %v1995_v33, %v1820_v24 }
 0x35a   : > { %v2010_v38 = vadd.f32 %v2009_v37, %v1996_v36  ;;  %2200 = vmatmul.bf16.vlgmr.msrb.gmra.mxu3 %v2045_v35 }
 0x35c   : > { %v2042_v40 = vmax.f32 %v2010_v38, 0.0 }
 0x35e   : > { %v2044_v41 = vpack.c.bf16 %v2042_v40, %v2040_v39 }
 0x360   : > { %2186 = vmatmul.bf16.vlgmr.msrb.gmra.mxu2 %v2044_v41 }
 0x3dd   : > { %v2201_v42 = vpop.f32.mrf.mxu3 }
 0x3e3   : > { %v2187_v43 = vpop.f32.mrf.mxu2 }
 0x3e4   : > { %v2188_v45 = vadd.f32 %v3491_v44, %v2187_v43 }
 0x3e5   : > { %v2203_v48 = vpop.f32.mrf.mxu3 }
 0x3e6   : > { %v2202_v49 = vadd.f32 %v2201_v42, %v2188_v45 }
 0x3eb   : > { %v2189_v46 = vpop.f32.mrf.mxu2 }
 0x3ec   : > { %v2190_v47 = vadd.f32 %v3491_v44, %v2189_v46 }
 0x3ee   : > { %v2204_v50 = vadd.f32 %v2203_v48, %v2190_v47 }
 0x3f0   : > { %v3364_v51 = vpack.c.bf16 %v2204_v50, %v2202_v49 }
 0x3f2   : > { %3365 = vst [vmem:[%s574_s20] sm:$0xff] %v3364_v51  }
 0x3f3   : > { %3759 = shalt.err (!%p3756_p9)
}
 0x3f4   : > { %s3829_s14 = smov 64   ;;  %s3830_s9 = smov 4  }
 0x3f5   : > { %3396 = dma.vmem_to_hbm [thread:$0]  (%p4012_p13), %s2224_s13, 128, %s2226_s30, %s2211_s15, %s3829_s14, %s3829_s14, %s3830_s9  }
 0x3f6 PF: > { %s2240_s18 = sand.u32 1, %s3802_s25   ;;  %p4164_p10 = scmp.ge.s32.totalorder %s3814_s28, 2 }
 0x3f7   : > { %s2241_s19 = scalar_lea.sflag [#allocation4], %s2240_s18 }
 0x3f8   : > { %p3425_p11 = pnand %p4164_p10, %p4017_p4 }
 0x3fa   : > { %p3426_p0 = pneg %p3425_p11 }
 0x3fc   : > { %3797 = dma.done.wait (%p3426_p0), %s2241_s19, 128  }
 0x3fd   : > { %3799 = vsyncadd (%p3426_p0), %s2241_s19, 4294967168  ;;  %p30_p2 = scmp.ge.s32.totalorder %s3992_s29, 4   ;;  %s4165_s25 = smov %s3806_s26 }
 0x3fe   : > { %s4166_s26 = smov %s3810_s27  ;;  %s4167_s27 = smov %s4004_s2 }
 0x3ff   : > { %s4168_s28 = smov %s3992_s29  ;;  %32 = sbr.rel (!%p30_p2) target bundleno = 17 (0x11), region = 145 }
 0x404   :  { %2247 = vsyncpa [#allocation3], 1 }
 0x405   :  { %2249 = vsyncpa [#allocation3 + $0x1], 1 }
 0x406   :  { %2250 = vsyncpa [#allocation6], 1 }
 0x407   :  { %2251 = vsyncpa [#allocation9], 1 }
 0x408   :  { %2252 = vsyncpa [#allocation12], 1 }
 0x409   :  { %2253 = vsyncpa [#allocation15], 1 }
 0x40a   :  { %2254 = vsyncpa [#allocation4], 1 }
 0x40b   :  { %2256 = vsyncpa [#allocation4 + $0x1], 1 }

</bundles_post_ra>
